<compile_context>
chip_gen: v6e
topology: v6e:2x2x1
jax: 0.10.0
libtpu: 0.0.40
codegen_flags: <defaults>
</compile_context>

<pallas_src>
import jax
import jax.numpy as jnp
from jax import lax
from jax.experimental import pallas as pl
from jax.experimental.pallas import tpu as pltpu


def _round_up(x, m):
    return (x + m - 1) // m * m


# ----------------------------- Pallas kernel ------------------------------ #
def policy_net_kernel(x_ref, sel_ref, bias_ref,
                      wih_ref, whh_ref, bih_ref, bhh_ref,
                      w1_ref, b1_ref, w2_ref, b2_ref,
                      out_ref, gi_ref):
    # x_ref:    (T, Bp, Op)   f32  time-major, zero-padded observations
    # sel_ref:  (T, Bp, 1)    f32  1.0 at t == length-1, else 0.0
    # bias_ref: (Bp, Ap)      f32  additive logits bias (0 or -1e30)
    # wih_ref:  (Op, 3Hp)  whh_ref: (Hp, 3Hp)   gate order [r | z | n], each
    #                                            gate block 128-aligned.
    # bih_ref/bhh_ref: (1, 3Hp)
    # w1_ref: (Hp, Hp), b1_ref: (1, Hp), w2_ref: (Hp, Ap), b2_ref: (1, Ap)
    # gi_ref:  VMEM scratch (T, Bp, 3Hp) for the hoisted input projection.
    T, Bp, Op = x_ref.shape
    Hp = whh_ref.shape[0]

    # ---- hoisted input projection: ONE large matmul over all timesteps ----
    x2d = x_ref[...].reshape(T * Bp, Op)
    gi_all = jnp.dot(x2d, wih_ref[...], preferred_element_type=jnp.float32)
    gi_all = gi_all + bih_ref[...]
    gi_ref[...] = gi_all.reshape(T, Bp, 3 * Hp)

    # Hoist loop-invariant values (JAX does not CSE broadcasts inside loops).
    whh = whh_ref[...]
    bhh = jnp.broadcast_to(bhh_ref[...], (Bp, 3 * Hp))

    h0 = jnp.zeros((Bp, Hp), jnp.float32)

    def step(t, carry):
        h, h_last = carry
        gi = gi_ref[t]                                   # (Bp, 3Hp)
        gh = jnp.dot(h, whh, preferred_element_type=jnp.float32) + bhh
        # 128-aligned gate slices -> free views, no lane shifts.
        i_r, i_z, i_n = gi[:, 0:Hp], gi[:, Hp:2 * Hp], gi[:, 2 * Hp:3 * Hp]
        h_r, h_z, h_n = gh[:, 0:Hp], gh[:, Hp:2 * Hp], gh[:, 2 * Hp:3 * Hp]
        r = jax.nn.sigmoid(i_r + h_r)
        z = jax.nn.sigmoid(i_z + h_z)
        n = jnp.tanh(i_n + r * h_n)
        h_new = (1.0 - z) * n + z * h
        # Capture h at t == length-1 via precomputed one-hot selector.
        h_last = h_last + sel_ref[t] * h_new
        return h_new, h_last

    _, h_last = lax.fori_loop(0, T, step, (h0, h0), unroll=True)

    # fc1 + relu
    hid = jnp.maximum(
        jnp.dot(h_last, w1_ref[...], preferred_element_type=jnp.float32)
        + b1_ref[...], 0.0)
    # fc2 + additive action mask (-1e30 on masked / padded actions)
    logits = (jnp.dot(hid, w2_ref[...], preferred_element_type=jnp.float32)
              + b2_ref[...] + bias_ref[...])
    # softmax(dim=1), lane-dense (Bp, Ap) output store
    m = jnp.max(logits, axis=1, keepdims=True)
    e = jnp.exp(logits - m)
    out_ref[...] = e / jnp.sum(e, axis=1, keepdims=True)


# ------------------------------ host wrapper ------------------------------ #
def policy_net_forward(x_bto, lengths, action_mask, p):
    """x_bto: (B, T, O) batch-first, zero-padded (pad_sequence equivalent)."""
    B, T, O = x_bto.shape
    H = p["w1"].shape[0]
    A = p["w2"].shape[0]

    # Tile-aligned padded sizes: lanes -> 128, sublanes (batch) -> 8.
    Bp = _round_up(max(B, 8), 8)
    Op = _round_up(O, 128)
    Hp = _round_up(H, 128)
    Ap = _round_up(A, 128)

    f32 = jnp.float32
    NEG = jnp.float32(-1e30)

    # x: (B, T, O) -> time-major padded (T, Bp, Op)
    x_tbo = jnp.transpose(x_bto.astype(f32), (1, 0, 2))
    x_pad = jnp.zeros((T, Bp, Op), f32).at[:, :B, :O].set(x_tbo)

    # One-hot last-step selector (T, Bp, 1): 1.0 where t == length-1.
    lengths = lengths.astype(jnp.int32)
    sel = (jnp.arange(T, dtype=jnp.int32)[:, None]
           == (lengths - 1)[None, :]).astype(f32)                  # (T, B)
    last_sel = jnp.zeros((T, Bp, 1), f32).at[:, :B, 0].set(sel)

    # Additive logits bias: -1e30 on masked actions and on padded columns/rows.
    mask_bias = jnp.full((Bp, Ap), NEG, f32)
    mask_bias = mask_bias.at[:B, :A].set(
        jnp.where(action_mask, NEG, jnp.float32(0.0)))

    # Gate-aligned, tile-padded weight packing (gate order [r, z, n]).
    def pack_gate_w(w, in_dim, in_pad):                 # w: (3H, in_dim)
        out = jnp.zeros((in_pad, 3 * Hp), f32)
        for g in range(3):
            blk = w[g * H:(g + 1) * H, :].astype(f32).T  # (in_dim, H)
            out = out.at[:in_dim, g * Hp:g * Hp + H].set(blk)
        return out

    def pack_gate_b(b):                                  # b: (3H,)
        out = jnp.zeros((1, 3 * Hp), f32)
        for g in range(3):
            out = out.at[0, g * Hp:g * Hp + H].set(b[g * H:(g + 1) * H].astype(f32))
        return out

    wih = pack_gate_w(p["w_ih"], O, Op)                  # (Op, 3Hp)
    whh = pack_gate_w(p["w_hh"], H, Hp)                  # (Hp, 3Hp)
    bih = pack_gate_b(p["b_ih"])                         # (1, 3Hp)
    bhh = pack_gate_b(p["b_hh"])                         # (1, 3Hp)

    w1 = jnp.zeros((Hp, Hp), f32).at[:H, :H].set(p["w1"].astype(f32).T)
    b1 = jnp.zeros((1, Hp), f32).at[0, :H].set(p["b1"].astype(f32))
    w2 = jnp.zeros((Hp, Ap), f32).at[:H, :A].set(p["w2"].astype(f32).T)
    b2 = jnp.zeros((1, Ap), f32).at[0, :A].set(p["b2"].astype(f32))

    args = (x_pad, last_sel, mask_bias,
            wih, whh, bih, bhh,
            w1, b1, w2, b2)

    vmem = pl.BlockSpec(memory_space=pltpu.MemorySpace.VMEM)
    out_padded = pl.pallas_call(
        policy_net_kernel,
        out_shape=jax.ShapeDtypeStruct((Bp, Ap), jnp.float32),
        in_specs=[vmem] * len(args),
        out_specs=vmem,
        scratch_shapes=[pltpu.VMEM((T, Bp, 3 * Hp), jnp.float32)],
    )(*args)
    return out_padded[:B, :A]


# ----------------------- pure-JAX reference (check) ------------------------ #
def reference_forward(x_bto, lengths, action_mask, p):
    B, T, O = x_bto.shape
    H = p["w1"].shape[0]

    def gru_step(h, x_t):
        gi = x_t @ p["w_ih"].T + p["b_ih"]
        gh = h @ p["w_hh"].T + p["b_hh"]
        i_r, i_z, i_n = jnp.split(gi, 3, axis=1)
        h_r, h_z, h_n = jnp.split(gh, 3, axis=1)
        r = jax.nn.sigmoid(i_r + h_r)
        z = jax.nn.sigmoid(i_z + h_z)
        n = jnp.tanh(i_n + r * h_n)
        h_new = (1.0 - z) * n + z * h
        return h_new, h_new

    h0 = jnp.zeros((B, H), jnp.float32)
    _, hs = lax.scan(gru_step, h0, jnp.transpose(x_bto, (1, 0, 2)))
    hs = jnp.transpose(hs, (1, 0, 2))                       # (B, T, H)
    tmask = jnp.arange(T)[None, :] < lengths[:, None]
    hs = hs * tmask[:, :, None].astype(jnp.float32)
    h_last = hs[jnp.arange(B), lengths - 1]
    hid = jax.nn.relu(h_last @ p["w1"].T + p["b1"])
    logits = hid @ p["w2"].T + p["b2"]
    logits = jnp.where(action_mask, -jnp.inf, logits)
    return jax.nn.softmax(logits, axis=1)


def init_params(key, O, H, A):
    ks = jax.random.split(key, 8)
    s = 1.0 / (H ** 0.5)
    u = lambda k, shape: jax.random.uniform(k, shape, jnp.float32, -s, s)
    return dict(
        w_ih=u(ks[0], (3 * H, O)), w_hh=u(ks[1], (3 * H, H)),
        b_ih=u(ks[2], (3 * H,)), b_hh=u(ks[3], (3 * H,)),
        w1=u(ks[4], (H, H)), b1=u(ks[5], (H,)),
        w2=u(ks[6], (A, H)), b2=u(ks[7], (A,)),
    )


if __name__ == "__main__":
    key = jax.random.PRNGKey(0)
    B, T, OBS, HID, ACT = 2, 8, 16, 32, 8

    kp, kx = jax.random.split(key)
    params = init_params(kp, OBS, HID, ACT)

    # Variable-length sequences, zero-padded (pad_sequence equivalent).
    lengths = jnp.array([8, 5], dtype=jnp.int32)
    x = jax.random.normal(kx, (B, T, OBS), jnp.float32)
    tmask = (jnp.arange(T)[None, :] < lengths[:, None]).astype(jnp.float32)
    x = x * tmask[:, :, None]

    action_mask = jnp.array(
        [[0, 1, 0, 0, 0, 0, 1, 0],
         [0, 0, 0, 1, 0, 0, 0, 0]], dtype=bool)

    out = policy_net_forward(x, lengths, action_mask, params)
    out = jax.block_until_ready(out)

    ref = reference_forward(x, lengths, action_mask, params)
    assert out.shape == (B, ACT)
    assert jnp.allclose(out, ref, atol=1e-4, rtol=1e-4), (out, ref)

    print("KERNEL_OK")
</pallas_src>

<mosaic_0001>
module attributes {stable_mosaic.version = 11 : i64} {
  func.func @policy_net_kernel(%arg0: memref<8x8x128xf32, #tpu.memory_space<vmem>>, %arg1: memref<8x8x1xf32, #tpu.memory_space<vmem>>, %arg2: memref<8x128xf32, #tpu.memory_space<vmem>>, %arg3: memref<128x384xf32, #tpu.memory_space<vmem>>, %arg4: memref<128x384xf32, #tpu.memory_space<vmem>>, %arg5: memref<1x384xf32, #tpu.memory_space<vmem>>, %arg6: memref<1x384xf32, #tpu.memory_space<vmem>>, %arg7: memref<128x128xf32, #tpu.memory_space<vmem>>, %arg8: memref<1x128xf32, #tpu.memory_space<vmem>>, %arg9: memref<128x128xf32, #tpu.memory_space<vmem>>, %arg10: memref<1x128xf32, #tpu.memory_space<vmem>>, %arg11: memref<8x128xf32, #tpu.memory_space<vmem>>, %arg12: memref<8x8x384xf32, #tpu.memory_space<vmem>>) attributes {dimension_semantics = [], scalar_prefetch = 0 : i64, scratch_operands = 1 : i64, tpu.core_type = #tpu.core_type<tc>} {
    %c0 = arith.constant 0 : index
    %c0_0 = arith.constant 0 : index
    %c0_1 = arith.constant 0 : index
    %0 = vector.load %arg0[%c0, %c0_0, %c0_1] : memref<8x8x128xf32, #tpu.memory_space<vmem>>, vector<8x8x128xf32>
    %1 = vector.shape_cast %0 : vector<8x8x128xf32> to vector<64x128xf32>
    %c0_2 = arith.constant 0 : index
    %c0_3 = arith.constant 0 : index
    %2 = vector.load %arg3[%c0_2, %c0_3] : memref<128x384xf32, #tpu.memory_space<vmem>>, vector<128x384xf32>
    %cst = arith.constant dense<0.000000e+00> : vector<64x384xf32>
    %3 = tpu.matmul %1, %2, %cst {dimension_numbers = #tpu.dot_dimension_numbers<[1], [0], [0], [1], [0, 0, 1, 1], [], []>} : vector<64x128xf32>, vector<128x384xf32>, vector<64x384xf32> -> vector<64x384xf32>
    %c0_4 = arith.constant 0 : index
    %c0_5 = arith.constant 0 : index
    %4 = vector.load %arg5[%c0_4, %c0_5] : memref<1x384xf32, #tpu.memory_space<vmem>>, vector<1x384xf32>
    %5 = vector.broadcast %4 : vector<1x384xf32> to vector<64x384xf32>
    %6 = arith.addf %3, %5 : vector<64x384xf32>
    %7 = vector.shape_cast %6 : vector<64x384xf32> to vector<8x8x384xf32>
    %c0_6 = arith.constant 0 : index
    %c0_7 = arith.constant 0 : index
    %c0_8 = arith.constant 0 : index
    %8 = vector.load %arg12[%c0_6, %c0_7, %c0_8] : memref<8x8x384xf32, #tpu.memory_space<vmem>>, vector<8x8x384xf32>
    tpu.vector_store %arg12[%c0_6, %c0_7, %c0_8], %7 {strides = array<i32>} : memref<8x8x384xf32, #tpu.memory_space<vmem>>, vector<8x8x384xf32>,
    %c0_9 = arith.constant 0 : index
    %c0_10 = arith.constant 0 : index
    %9 = vector.load %arg4[%c0_9, %c0_10] : memref<128x384xf32, #tpu.memory_space<vmem>>, vector<128x384xf32>
    %c0_11 = arith.constant 0 : index
    %c0_12 = arith.constant 0 : index
    %10 = vector.load %arg6[%c0_11, %c0_12] : memref<1x384xf32, #tpu.memory_space<vmem>>, vector<1x384xf32>
    %11 = vector.shape_cast %10 : vector<1x384xf32> to vector<1x384xf32>
    %12 = vector.broadcast %11 : vector<1x384xf32> to vector<8x384xf32>
    %cst_13 = arith.constant 0.000000e+00 : f32
    %13 = vector.broadcast %cst_13 : f32 to vector<8x128xf32>
    %c0_i32 = arith.constant 0 : i32
    %14 = arith.index_cast %c0_i32 : i32 to index
    %c0_14 = arith.constant 0 : index
    %c0_15 = arith.constant 0 : index
    %15 = vector.load %arg12[%14, %c0_14, %c0_15] : memref<8x8x384xf32, #tpu.memory_space<vmem>>, vector<1x8x384xf32>
    %16 = vector.shape_cast %15 : vector<1x8x384xf32> to vector<8x384xf32>
    %cst_16 = arith.constant dense<0.000000e+00> : vector<8x384xf32>
    %17 = tpu.matmul %13, %9, %cst_16 {dimension_numbers = #tpu.dot_dimension_numbers<[1], [0], [0], [1], [0, 0, 1, 1], [], []>} : vector<8x128xf32>, vector<128x384xf32>, vector<8x384xf32> -> vector<8x384xf32>
    %18 = arith.addf %17, %12 : vector<8x384xf32>
    %19 = vector.extract_strided_slice %16 {offsets = [0, 0], sizes = [8, 128], strides = [1, 1]} : vector<8x384xf32> to vector<8x128xf32>
    %20 = vector.extract_strided_slice %16 {offsets = [0, 128], sizes = [8, 128], strides = [1, 1]} : vector<8x384xf32> to vector<8x128xf32>
    %21 = vector.extract_strided_slice %16 {offsets = [0, 256], sizes = [8, 128], strides = [1, 1]} : vector<8x384xf32> to vector<8x128xf32>
    %22 = vector.extract_strided_slice %18 {offsets = [0, 0], sizes = [8, 128], strides = [1, 1]} : vector<8x384xf32> to vector<8x128xf32>
    %23 = vector.extract_strided_slice %18 {offsets = [0, 128], sizes = [8, 128], strides = [1, 1]} : vector<8x384xf32> to vector<8x128xf32>
    %24 = vector.extract_strided_slice %18 {offsets = [0, 256], sizes = [8, 128], strides = [1, 1]} : vector<8x384xf32> to vector<8x128xf32>
    %25 = arith.addf %19, %22 : vector<8x128xf32>
    %26 = arith.negf %25 : vector<8x128xf32>
    %27 = math.exp %26 : vector<8x128xf32>
    %cst_17 = arith.constant 1.000000e+00 : f32
    %28 = vector.broadcast %cst_17 : f32 to vector<8x128xf32>
    %29 = arith.addf %28, %27 : vector<8x128xf32>
    %30 = arith.divf %28, %29 : vector<8x128xf32>
    %31 = arith.addf %20, %23 : vector<8x128xf32>
    %32 = arith.negf %31 : vector<8x128xf32>
    %33 = math.exp %32 : vector<8x128xf32>
    %cst_18 = arith.constant 1.000000e+00 : f32
    %34 = vector.broadcast %cst_18 : f32 to vector<8x128xf32>
    %35 = arith.addf %34, %33 : vector<8x128xf32>
    %36 = arith.divf %34, %35 : vector<8x128xf32>
    %37 = arith.mulf %30, %24 : vector<8x128xf32>
    %38 = arith.addf %21, %37 : vector<8x128xf32>
    %39 = math.tanh %38 : vector<8x128xf32>
    %cst_19 = arith.constant 1.000000e+00 : f32
    %40 = vector.broadcast %cst_19 : f32 to vector<8x128xf32>
    %41 = arith.subf %40, %36 : vector<8x128xf32>
    %42 = arith.mulf %41, %39 : vector<8x128xf32>
    %43 = arith.mulf %36, %13 : vector<8x128xf32>
    %44 = arith.addf %42, %43 : vector<8x128xf32>
    %45 = arith.index_cast %c0_i32 : i32 to index
    %c0_20 = arith.constant 0 : index
    %c0_21 = arith.constant 0 : index
    %46 = vector.load %arg1[%45, %c0_20, %c0_21] : memref<8x8x1xf32, #tpu.memory_space<vmem>>, vector<1x8x1xf32>
    %47 = vector.shape_cast %46 : vector<1x8x1xf32> to vector<8x1xf32>
    %48 = vector.broadcast %47 : vector<8x1xf32> to vector<8x128xf32>
    %49 = arith.mulf %48, %44 : vector<8x128xf32>
    %50 = arith.addf %13, %49 : vector<8x128xf32>
    %c1_i32 = arith.constant 1 : i32
    %51 = arith.index_cast %c1_i32 : i32 to index
    %c0_22 = arith.constant 0 : index
    %c0_23 = arith.constant 0 : index
    %52 = vector.load %arg12[%51, %c0_22, %c0_23] : memref<8x8x384xf32, #tpu.memory_space<vmem>>, vector<1x8x384xf32>
    %53 = vector.shape_cast %52 : vector<1x8x384xf32> to vector<8x384xf32>
    %cst_24 = arith.constant dense<0.000000e+00> : vector<8x384xf32>
    %54 = tpu.matmul %44, %9, %cst_24 {dimension_numbers = #tpu.dot_dimension_numbers<[1], [0], [0], [1], [0, 0, 1, 1], [], []>} : vector<8x128xf32>, vector<128x384xf32>, vector<8x384xf32> -> vector<8x384xf32>
    %55 = arith.addf %54, %12 : vector<8x384xf32>
    %56 = vector.extract_strided_slice %53 {offsets = [0, 0], sizes = [8, 128], strides = [1, 1]} : vector<8x384xf32> to vector<8x128xf32>
    %57 = vector.extract_strided_slice %53 {offsets = [0, 128], sizes = [8, 128], strides = [1, 1]} : vector<8x384xf32> to vector<8x128xf32>
    %58 = vector.extract_strided_slice %53 {offsets = [0, 256], sizes = [8, 128], strides = [1, 1]} : vector<8x384xf32> to vector<8x128xf32>
    %59 = vector.extract_strided_slice %55 {offsets = [0, 0], sizes = [8, 128], strides = [1, 1]} : vector<8x384xf32> to vector<8x128xf32>
    %60 = vector.extract_strided_slice %55 {offsets = [0, 128], sizes = [8, 128], strides = [1, 1]} : vector<8x384xf32> to vector<8x128xf32>
    %61 = vector.extract_strided_slice %55 {offsets = [0, 256], sizes = [8, 128], strides = [1, 1]} : vector<8x384xf32> to vector<8x128xf32>
    %62 = arith.addf %56, %59 : vector<8x128xf32>
    %63 = arith.negf %62 : vector<8x128xf32>
    %64 = math.exp %63 : vector<8x128xf32>
    %cst_25 = arith.constant 1.000000e+00 : f32
    %65 = vector.broadcast %cst_25 : f32 to vector<8x128xf32>
    %66 = arith.addf %65, %64 : vector<8x128xf32>
    %67 = arith.divf %65, %66 : vector<8x128xf32>
    %68 = arith.addf %57, %60 : vector<8x128xf32>
    %69 = arith.negf %68 : vector<8x128xf32>
    %70 = math.exp %69 : vector<8x128xf32>
    %cst_26 = arith.constant 1.000000e+00 : f32
    %71 = vector.broadcast %cst_26 : f32 to vector<8x128xf32>
    %72 = arith.addf %71, %70 : vector<8x128xf32>
    %73 = arith.divf %71, %72 : vector<8x128xf32>
    %74 = arith.mulf %67, %61 : vector<8x128xf32>
    %75 = arith.addf %58, %74 : vector<8x128xf32>
    %76 = math.tanh %75 : vector<8x128xf32>
    %cst_27 = arith.constant 1.000000e+00 : f32
    %77 = vector.broadcast %cst_27 : f32 to vector<8x128xf32>
    %78 = arith.subf %77, %73 : vector<8x128xf32>
    %79 = arith.mulf %78, %76 : vector<8x128xf32>
    %80 = arith.mulf %73, %44 : vector<8x128xf32>
    %81 = arith.addf %79, %80 : vector<8x128xf32>
    %82 = arith.index_cast %c1_i32 : i32 to index
    %c0_28 = arith.constant 0 : index
    %c0_29 = arith.constant 0 : index
    %83 = vector.load %arg1[%82, %c0_28, %c0_29] : memref<8x8x1xf32, #tpu.memory_space<vmem>>, vector<1x8x1xf32>
    %84 = vector.shape_cast %83 : vector<1x8x1xf32> to vector<8x1xf32>
    %85 = vector.broadcast %84 : vector<8x1xf32> to vector<8x128xf32>
    %86 = arith.mulf %85, %81 : vector<8x128xf32>
    %87 = arith.addf %50, %86 : vector<8x128xf32>
    %c2_i32 = arith.constant 2 : i32
    %88 = arith.index_cast %c2_i32 : i32 to index
    %c0_30 = arith.constant 0 : index
    %c0_31 = arith.constant 0 : index
    %89 = vector.load %arg12[%88, %c0_30, %c0_31] : memref<8x8x384xf32, #tpu.memory_space<vmem>>, vector<1x8x384xf32>
    %90 = vector.shape_cast %89 : vector<1x8x384xf32> to vector<8x384xf32>
    %cst_32 = arith.constant dense<0.000000e+00> : vector<8x384xf32>
    %91 = tpu.matmul %81, %9, %cst_32 {dimension_numbers = #tpu.dot_dimension_numbers<[1], [0], [0], [1], [0, 0, 1, 1], [], []>} : vector<8x128xf32>, vector<128x384xf32>, vector<8x384xf32> -> vector<8x384xf32>
    %92 = arith.addf %91, %12 : vector<8x384xf32>
    %93 = vector.extract_strided_slice %90 {offsets = [0, 0], sizes = [8, 128], strides = [1, 1]} : vector<8x384xf32> to vector<8x128xf32>
    %94 = vector.extract_strided_slice %90 {offsets = [0, 128], sizes = [8, 128], strides = [1, 1]} : vector<8x384xf32> to vector<8x128xf32>
    %95 = vector.extract_strided_slice %90 {offsets = [0, 256], sizes = [8, 128], strides = [1, 1]} : vector<8x384xf32> to vector<8x128xf32>
    %96 = vector.extract_strided_slice %92 {offsets = [0, 0], sizes = [8, 128], strides = [1, 1]} : vector<8x384xf32> to vector<8x128xf32>
    %97 = vector.extract_strided_slice %92 {offsets = [0, 128], sizes = [8, 128], strides = [1, 1]} : vector<8x384xf32> to vector<8x128xf32>
    %98 = vector.extract_strided_slice %92 {offsets = [0, 256], sizes = [8, 128], strides = [1, 1]} : vector<8x384xf32> to vector<8x128xf32>
    %99 = arith.addf %93, %96 : vector<8x128xf32>
    %100 = arith.negf %99 : vector<8x128xf32>
    %101 = math.exp %100 : vector<8x128xf32>
    %cst_33 = arith.constant 1.000000e+00 : f32
    %102 = vector.broadcast %cst_33 : f32 to vector<8x128xf32>
    %103 = arith.addf %102, %101 : vector<8x128xf32>
    %104 = arith.divf %102, %103 : vector<8x128xf32>
    %105 = arith.addf %94, %97 : vector<8x128xf32>
    %106 = arith.negf %105 : vector<8x128xf32>
    %107 = math.exp %106 : vector<8x128xf32>
    %cst_34 = arith.constant 1.000000e+00 : f32
    %108 = vector.broadcast %cst_34 : f32 to vector<8x128xf32>
    %109 = arith.addf %108, %107 : vector<8x128xf32>
    %110 = arith.divf %108, %109 : vector<8x128xf32>
    %111 = arith.mulf %104, %98 : vector<8x128xf32>
    %112 = arith.addf %95, %111 : vector<8x128xf32>
    %113 = math.tanh %112 : vector<8x128xf32>
    %cst_35 = arith.constant 1.000000e+00 : f32
    %114 = vector.broadcast %cst_35 : f32 to vector<8x128xf32>
    %115 = arith.subf %114, %110 : vector<8x128xf32>
    %116 = arith.mulf %115, %113 : vector<8x128xf32>
    %117 = arith.mulf %110, %81 : vector<8x128xf32>
    %118 = arith.addf %116, %117 : vector<8x128xf32>
    %119 = arith.index_cast %c2_i32 : i32 to index
    %c0_36 = arith.constant 0 : index
    %c0_37 = arith.constant 0 : index
    %120 = vector.load %arg1[%119, %c0_36, %c0_37] : memref<8x8x1xf32, #tpu.memory_space<vmem>>, vector<1x8x1xf32>
    %121 = vector.shape_cast %120 : vector<1x8x1xf32> to vector<8x1xf32>
    %122 = vector.broadcast %121 : vector<8x1xf32> to vector<8x128xf32>
    %123 = arith.mulf %122, %118 : vector<8x128xf32>
    %124 = arith.addf %87, %123 : vector<8x128xf32>
    %c3_i32 = arith.constant 3 : i32
    %125 = arith.index_cast %c3_i32 : i32 to index
    %c0_38 = arith.constant 0 : index
    %c0_39 = arith.constant 0 : index
    %126 = vector.load %arg12[%125, %c0_38, %c0_39] : memref<8x8x384xf32, #tpu.memory_space<vmem>>, vector<1x8x384xf32>
    %127 = vector.shape_cast %126 : vector<1x8x384xf32> to vector<8x384xf32>
    %cst_40 = arith.constant dense<0.000000e+00> : vector<8x384xf32>
    %128 = tpu.matmul %118, %9, %cst_40 {dimension_numbers = #tpu.dot_dimension_numbers<[1], [0], [0], [1], [0, 0, 1, 1], [], []>} : vector<8x128xf32>, vector<128x384xf32>, vector<8x384xf32> -> vector<8x384xf32>
    %129 = arith.addf %128, %12 : vector<8x384xf32>
    %130 = vector.extract_strided_slice %127 {offsets = [0, 0], sizes = [8, 128], strides = [1, 1]} : vector<8x384xf32> to vector<8x128xf32>
    %131 = vector.extract_strided_slice %127 {offsets = [0, 128], sizes = [8, 128], strides = [1, 1]} : vector<8x384xf32> to vector<8x128xf32>
    %132 = vector.extract_strided_slice %127 {offsets = [0, 256], sizes = [8, 128], strides = [1, 1]} : vector<8x384xf32> to vector<8x128xf32>
    %133 = vector.extract_strided_slice %129 {offsets = [0, 0], sizes = [8, 128], strides = [1, 1]} : vector<8x384xf32> to vector<8x128xf32>
    %134 = vector.extract_strided_slice %129 {offsets = [0, 128], sizes = [8, 128], strides = [1, 1]} : vector<8x384xf32> to vector<8x128xf32>
    %135 = vector.extract_strided_slice %129 {offsets = [0, 256], sizes = [8, 128], strides = [1, 1]} : vector<8x384xf32> to vector<8x128xf32>
    %136 = arith.addf %130, %133 : vector<8x128xf32>
    %137 = arith.negf %136 : vector<8x128xf32>
    %138 = math.exp %137 : vector<8x128xf32>
    %cst_41 = arith.constant 1.000000e+00 : f32
    %139 = vector.broadcast %cst_41 : f32 to vector<8x128xf32>
    %140 = arith.addf %139, %138 : vector<8x128xf32>
    %141 = arith.divf %139, %140 : vector<8x128xf32>
    %142 = arith.addf %131, %134 : vector<8x128xf32>
    %143 = arith.negf %142 : vector<8x128xf32>
    %144 = math.exp %143 : vector<8x128xf32>
    %cst_42 = arith.constant 1.000000e+00 : f32
    %145 = vector.broadcast %cst_42 : f32 to vector<8x128xf32>
    %146 = arith.addf %145, %144 : vector<8x128xf32>
    %147 = arith.divf %145, %146 : vector<8x128xf32>
    %148 = arith.mulf %141, %135 : vector<8x128xf32>
    %149 = arith.addf %132, %148 : vector<8x128xf32>
    %150 = math.tanh %149 : vector<8x128xf32>
    %cst_43 = arith.constant 1.000000e+00 : f32
    %151 = vector.broadcast %cst_43 : f32 to vector<8x128xf32>
    %152 = arith.subf %151, %147 : vector<8x128xf32>
    %153 = arith.mulf %152, %150 : vector<8x128xf32>
    %154 = arith.mulf %147, %118 : vector<8x128xf32>
    %155 = arith.addf %153, %154 : vector<8x128xf32>
    %156 = arith.index_cast %c3_i32 : i32 to index
    %c0_44 = arith.constant 0 : index
    %c0_45 = arith.constant 0 : index
    %157 = vector.load %arg1[%156, %c0_44, %c0_45] : memref<8x8x1xf32, #tpu.memory_space<vmem>>, vector<1x8x1xf32>
    %158 = vector.shape_cast %157 : vector<1x8x1xf32> to vector<8x1xf32>
    %159 = vector.broadcast %158 : vector<8x1xf32> to vector<8x128xf32>
    %160 = arith.mulf %159, %155 : vector<8x128xf32>
    %161 = arith.addf %124, %160 : vector<8x128xf32>
    %c4_i32 = arith.constant 4 : i32
    %162 = arith.index_cast %c4_i32 : i32 to index
    %c0_46 = arith.constant 0 : index
    %c0_47 = arith.constant 0 : index
    %163 = vector.load %arg12[%162, %c0_46, %c0_47] : memref<8x8x384xf32, #tpu.memory_space<vmem>>, vector<1x8x384xf32>
    %164 = vector.shape_cast %163 : vector<1x8x384xf32> to vector<8x384xf32>
    %cst_48 = arith.constant dense<0.000000e+00> : vector<8x384xf32>
    %165 = tpu.matmul %155, %9, %cst_48 {dimension_numbers = #tpu.dot_dimension_numbers<[1], [0], [0], [1], [0, 0, 1, 1], [], []>} : vector<8x128xf32>, vector<128x384xf32>, vector<8x384xf32> -> vector<8x384xf32>
    %166 = arith.addf %165, %12 : vector<8x384xf32>
    %167 = vector.extract_strided_slice %164 {offsets = [0, 0], sizes = [8, 128], strides = [1, 1]} : vector<8x384xf32> to vector<8x128xf32>
    %168 = vector.extract_strided_slice %164 {offsets = [0, 128], sizes = [8, 128], strides = [1, 1]} : vector<8x384xf32> to vector<8x128xf32>
    %169 = vector.extract_strided_slice %164 {offsets = [0, 256], sizes = [8, 128], strides = [1, 1]} : vector<8x384xf32> to vector<8x128xf32>
    %170 = vector.extract_strided_slice %166 {offsets = [0, 0], sizes = [8, 128], strides = [1, 1]} : vector<8x384xf32> to vector<8x128xf32>
    %171 = vector.extract_strided_slice %166 {offsets = [0, 128], sizes = [8, 128], strides = [1, 1]} : vector<8x384xf32> to vector<8x128xf32>
    %172 = vector.extract_strided_slice %166 {offsets = [0, 256], sizes = [8, 128], strides = [1, 1]} : vector<8x384xf32> to vector<8x128xf32>
    %173 = arith.addf %167, %170 : vector<8x128xf32>
    %174 = arith.negf %173 : vector<8x128xf32>
    %175 = math.exp %174 : vector<8x128xf32>
    %cst_49 = arith.constant 1.000000e+00 : f32
    %176 = vector.broadcast %cst_49 : f32 to vector<8x128xf32>
    %177 = arith.addf %176, %175 : vector<8x128xf32>
    %178 = arith.divf %176, %177 : vector<8x128xf32>
    %179 = arith.addf %168, %171 : vector<8x128xf32>
    %180 = arith.negf %179 : vector<8x128xf32>
    %181 = math.exp %180 : vector<8x128xf32>
    %cst_50 = arith.constant 1.000000e+00 : f32
    %182 = vector.broadcast %cst_50 : f32 to vector<8x128xf32>
    %183 = arith.addf %182, %181 : vector<8x128xf32>
    %184 = arith.divf %182, %183 : vector<8x128xf32>
    %185 = arith.mulf %178, %172 : vector<8x128xf32>
    %186 = arith.addf %169, %185 : vector<8x128xf32>
    %187 = math.tanh %186 : vector<8x128xf32>
    %cst_51 = arith.constant 1.000000e+00 : f32
    %188 = vector.broadcast %cst_51 : f32 to vector<8x128xf32>
    %189 = arith.subf %188, %184 : vector<8x128xf32>
    %190 = arith.mulf %189, %187 : vector<8x128xf32>
    %191 = arith.mulf %184, %155 : vector<8x128xf32>
    %192 = arith.addf %190, %191 : vector<8x128xf32>
    %193 = arith.index_cast %c4_i32 : i32 to index
    %c0_52 = arith.constant 0 : index
    %c0_53 = arith.constant 0 : index
    %194 = vector.load %arg1[%193, %c0_52, %c0_53] : memref<8x8x1xf32, #tpu.memory_space<vmem>>, vector<1x8x1xf32>
    %195 = vector.shape_cast %194 : vector<1x8x1xf32> to vector<8x1xf32>
    %196 = vector.broadcast %195 : vector<8x1xf32> to vector<8x128xf32>
    %197 = arith.mulf %196, %192 : vector<8x128xf32>
    %198 = arith.addf %161, %197 : vector<8x128xf32>
    %c5_i32 = arith.constant 5 : i32
    %199 = arith.index_cast %c5_i32 : i32 to index
    %c0_54 = arith.constant 0 : index
    %c0_55 = arith.constant 0 : index
    %200 = vector.load %arg12[%199, %c0_54, %c0_55] : memref<8x8x384xf32, #tpu.memory_space<vmem>>, vector<1x8x384xf32>
    %201 = vector.shape_cast %200 : vector<1x8x384xf32> to vector<8x384xf32>
    %cst_56 = arith.constant dense<0.000000e+00> : vector<8x384xf32>
    %202 = tpu.matmul %192, %9, %cst_56 {dimension_numbers = #tpu.dot_dimension_numbers<[1], [0], [0], [1], [0, 0, 1, 1], [], []>} : vector<8x128xf32>, vector<128x384xf32>, vector<8x384xf32> -> vector<8x384xf32>
    %203 = arith.addf %202, %12 : vector<8x384xf32>
    %204 = vector.extract_strided_slice %201 {offsets = [0, 0], sizes = [8, 128], strides = [1, 1]} : vector<8x384xf32> to vector<8x128xf32>
    %205 = vector.extract_strided_slice %201 {offsets = [0, 128], sizes = [8, 128], strides = [1, 1]} : vector<8x384xf32> to vector<8x128xf32>
    %206 = vector.extract_strided_slice %201 {offsets = [0, 256], sizes = [8, 128], strides = [1, 1]} : vector<8x384xf32> to vector<8x128xf32>
    %207 = vector.extract_strided_slice %203 {offsets = [0, 0], sizes = [8, 128], strides = [1, 1]} : vector<8x384xf32> to vector<8x128xf32>
    %208 = vector.extract_strided_slice %203 {offsets = [0, 128], sizes = [8, 128], strides = [1, 1]} : vector<8x384xf32> to vector<8x128xf32>
    %209 = vector.extract_strided_slice %203 {offsets = [0, 256], sizes = [8, 128], strides = [1, 1]} : vector<8x384xf32> to vector<8x128xf32>
    %210 = arith.addf %204, %207 : vector<8x128xf32>
    %211 = arith.negf %210 : vector<8x128xf32>
    %212 = math.exp %211 : vector<8x128xf32>
    %cst_57 = arith.constant 1.000000e+00 : f32
    %213 = vector.broadcast %cst_57 : f32 to vector<8x128xf32>
    %214 = arith.addf %213, %212 : vector<8x128xf32>
    %215 = arith.divf %213, %214 : vector<8x128xf32>
    %216 = arith.addf %205, %208 : vector<8x128xf32>
    %217 = arith.negf %216 : vector<8x128xf32>
    %218 = math.exp %217 : vector<8x128xf32>
    %cst_58 = arith.constant 1.000000e+00 : f32
    %219 = vector.broadcast %cst_58 : f32 to vector<8x128xf32>
    %220 = arith.addf %219, %218 : vector<8x128xf32>
    %221 = arith.divf %219, %220 : vector<8x128xf32>
    %222 = arith.mulf %215, %209 : vector<8x128xf32>
    %223 = arith.addf %206, %222 : vector<8x128xf32>
    %224 = math.tanh %223 : vector<8x128xf32>
    %cst_59 = arith.constant 1.000000e+00 : f32
    %225 = vector.broadcast %cst_59 : f32 to vector<8x128xf32>
    %226 = arith.subf %225, %221 : vector<8x128xf32>
    %227 = arith.mulf %226, %224 : vector<8x128xf32>
    %228 = arith.mulf %221, %192 : vector<8x128xf32>
    %229 = arith.addf %227, %228 : vector<8x128xf32>
    %230 = arith.index_cast %c5_i32 : i32 to index
    %c0_60 = arith.constant 0 : index
    %c0_61 = arith.constant 0 : index
    %231 = vector.load %arg1[%230, %c0_60, %c0_61] : memref<8x8x1xf32, #tpu.memory_space<vmem>>, vector<1x8x1xf32>
    %232 = vector.shape_cast %231 : vector<1x8x1xf32> to vector<8x1xf32>
    %233 = vector.broadcast %232 : vector<8x1xf32> to vector<8x128xf32>
    %234 = arith.mulf %233, %229 : vector<8x128xf32>
    %235 = arith.addf %198, %234 : vector<8x128xf32>
    %c6_i32 = arith.constant 6 : i32
    %236 = arith.index_cast %c6_i32 : i32 to index
    %c0_62 = arith.constant 0 : index
    %c0_63 = arith.constant 0 : index
    %237 = vector.load %arg12[%236, %c0_62, %c0_63] : memref<8x8x384xf32, #tpu.memory_space<vmem>>, vector<1x8x384xf32>
    %238 = vector.shape_cast %237 : vector<1x8x384xf32> to vector<8x384xf32>
    %cst_64 = arith.constant dense<0.000000e+00> : vector<8x384xf32>
    %239 = tpu.matmul %229, %9, %cst_64 {dimension_numbers = #tpu.dot_dimension_numbers<[1], [0], [0], [1], [0, 0, 1, 1], [], []>} : vector<8x128xf32>, vector<128x384xf32>, vector<8x384xf32> -> vector<8x384xf32>
    %240 = arith.addf %239, %12 : vector<8x384xf32>
    %241 = vector.extract_strided_slice %238 {offsets = [0, 0], sizes = [8, 128], strides = [1, 1]} : vector<8x384xf32> to vector<8x128xf32>
    %242 = vector.extract_strided_slice %238 {offsets = [0, 128], sizes = [8, 128], strides = [1, 1]} : vector<8x384xf32> to vector<8x128xf32>
    %243 = vector.extract_strided_slice %238 {offsets = [0, 256], sizes = [8, 128], strides = [1, 1]} : vector<8x384xf32> to vector<8x128xf32>
    %244 = vector.extract_strided_slice %240 {offsets = [0, 0], sizes = [8, 128], strides = [1, 1]} : vector<8x384xf32> to vector<8x128xf32>
    %245 = vector.extract_strided_slice %240 {offsets = [0, 128], sizes = [8, 128], strides = [1, 1]} : vector<8x384xf32> to vector<8x128xf32>
    %246 = vector.extract_strided_slice %240 {offsets = [0, 256], sizes = [8, 128], strides = [1, 1]} : vector<8x384xf32> to vector<8x128xf32>
    %247 = arith.addf %241, %244 : vector<8x128xf32>
    %248 = arith.negf %247 : vector<8x128xf32>
    %249 = math.exp %248 : vector<8x128xf32>
    %cst_65 = arith.constant 1.000000e+00 : f32
    %250 = vector.broadcast %cst_65 : f32 to vector<8x128xf32>
    %251 = arith.addf %250, %249 : vector<8x128xf32>
    %252 = arith.divf %250, %251 : vector<8x128xf32>
    %253 = arith.addf %242, %245 : vector<8x128xf32>
    %254 = arith.negf %253 : vector<8x128xf32>
    %255 = math.exp %254 : vector<8x128xf32>
    %cst_66 = arith.constant 1.000000e+00 : f32
    %256 = vector.broadcast %cst_66 : f32 to vector<8x128xf32>
    %257 = arith.addf %256, %255 : vector<8x128xf32>
    %258 = arith.divf %256, %257 : vector<8x128xf32>
    %259 = arith.mulf %252, %246 : vector<8x128xf32>
    %260 = arith.addf %243, %259 : vector<8x128xf32>
    %261 = math.tanh %260 : vector<8x128xf32>
    %cst_67 = arith.constant 1.000000e+00 : f32
    %262 = vector.broadcast %cst_67 : f32 to vector<8x128xf32>
    %263 = arith.subf %262, %258 : vector<8x128xf32>
    %264 = arith.mulf %263, %261 : vector<8x128xf32>
    %265 = arith.mulf %258, %229 : vector<8x128xf32>
    %266 = arith.addf %264, %265 : vector<8x128xf32>
    %267 = arith.index_cast %c6_i32 : i32 to index
    %c0_68 = arith.constant 0 : index
    %c0_69 = arith.constant 0 : index
    %268 = vector.load %arg1[%267, %c0_68, %c0_69] : memref<8x8x1xf32, #tpu.memory_space<vmem>>, vector<1x8x1xf32>
    %269 = vector.shape_cast %268 : vector<1x8x1xf32> to vector<8x1xf32>
    %270 = vector.broadcast %269 : vector<8x1xf32> to vector<8x128xf32>
    %271 = arith.mulf %270, %266 : vector<8x128xf32>
    %272 = arith.addf %235, %271 : vector<8x128xf32>
    %c7_i32 = arith.constant 7 : i32
    %273 = arith.index_cast %c7_i32 : i32 to index
    %c0_70 = arith.constant 0 : index
    %c0_71 = arith.constant 0 : index
    %274 = vector.load %arg12[%273, %c0_70, %c0_71] : memref<8x8x384xf32, #tpu.memory_space<vmem>>, vector<1x8x384xf32>
    %275 = vector.shape_cast %274 : vector<1x8x384xf32> to vector<8x384xf32>
    %cst_72 = arith.constant dense<0.000000e+00> : vector<8x384xf32>
    %276 = tpu.matmul %266, %9, %cst_72 {dimension_numbers = #tpu.dot_dimension_numbers<[1], [0], [0], [1], [0, 0, 1, 1], [], []>} : vector<8x128xf32>, vector<128x384xf32>, vector<8x384xf32> -> vector<8x384xf32>
    %277 = arith.addf %276, %12 : vector<8x384xf32>
    %278 = vector.extract_strided_slice %275 {offsets = [0, 0], sizes = [8, 128], strides = [1, 1]} : vector<8x384xf32> to vector<8x128xf32>
    %279 = vector.extract_strided_slice %275 {offsets = [0, 128], sizes = [8, 128], strides = [1, 1]} : vector<8x384xf32> to vector<8x128xf32>
    %280 = vector.extract_strided_slice %275 {offsets = [0, 256], sizes = [8, 128], strides = [1, 1]} : vector<8x384xf32> to vector<8x128xf32>
    %281 = vector.extract_strided_slice %277 {offsets = [0, 0], sizes = [8, 128], strides = [1, 1]} : vector<8x384xf32> to vector<8x128xf32>
    %282 = vector.extract_strided_slice %277 {offsets = [0, 128], sizes = [8, 128], strides = [1, 1]} : vector<8x384xf32> to vector<8x128xf32>
    %283 = vector.extract_strided_slice %277 {offsets = [0, 256], sizes = [8, 128], strides = [1, 1]} : vector<8x384xf32> to vector<8x128xf32>
    %284 = arith.addf %278, %281 : vector<8x128xf32>
    %285 = arith.negf %284 : vector<8x128xf32>
    %286 = math.exp %285 : vector<8x128xf32>
    %cst_73 = arith.constant 1.000000e+00 : f32
    %287 = vector.broadcast %cst_73 : f32 to vector<8x128xf32>
    %288 = arith.addf %287, %286 : vector<8x128xf32>
    %289 = arith.divf %287, %288 : vector<8x128xf32>
    %290 = arith.addf %279, %282 : vector<8x128xf32>
    %291 = arith.negf %290 : vector<8x128xf32>
    %292 = math.exp %291 : vector<8x128xf32>
    %cst_74 = arith.constant 1.000000e+00 : f32
    %293 = vector.broadcast %cst_74 : f32 to vector<8x128xf32>
    %294 = arith.addf %293, %292 : vector<8x128xf32>
    %295 = arith.divf %293, %294 : vector<8x128xf32>
    %296 = arith.mulf %289, %283 : vector<8x128xf32>
    %297 = arith.addf %280, %296 : vector<8x128xf32>
    %298 = math.tanh %297 : vector<8x128xf32>
    %cst_75 = arith.constant 1.000000e+00 : f32
    %299 = vector.broadcast %cst_75 : f32 to vector<8x128xf32>
    %300 = arith.subf %299, %295 : vector<8x128xf32>
    %301 = arith.mulf %300, %298 : vector<8x128xf32>
    %302 = arith.mulf %295, %266 : vector<8x128xf32>
    %303 = arith.addf %301, %302 : vector<8x128xf32>
    %304 = arith.index_cast %c7_i32 : i32 to index
    %c0_76 = arith.constant 0 : index
    %c0_77 = arith.constant 0 : index
    %305 = vector.load %arg1[%304, %c0_76, %c0_77] : memref<8x8x1xf32, #tpu.memory_space<vmem>>, vector<1x8x1xf32>
    %306 = vector.shape_cast %305 : vector<1x8x1xf32> to vector<8x1xf32>
    %307 = vector.broadcast %306 : vector<8x1xf32> to vector<8x128xf32>
    %308 = arith.mulf %307, %303 : vector<8x128xf32>
    %309 = arith.addf %272, %308 : vector<8x128xf32>
    %c8_i32 = arith.constant 8 : i32
    %c0_78 = arith.constant 0 : index
    %c0_79 = arith.constant 0 : index
    %310 = vector.load %arg7[%c0_78, %c0_79] : memref<128x128xf32, #tpu.memory_space<vmem>>, vector<128x128xf32>
    %cst_80 = arith.constant dense<0.000000e+00> : vector<8x128xf32>
    %311 = tpu.matmul %309, %310, %cst_80 {dimension_numbers = #tpu.dot_dimension_numbers<[1], [0], [0], [1], [0, 0, 1, 1], [], []>} : vector<8x128xf32>, vector<128x128xf32>, vector<8x128xf32> -> vector<8x128xf32>
    %c0_81 = arith.constant 0 : index
    %c0_82 = arith.constant 0 : index
    %312 = vector.load %arg8[%c0_81, %c0_82] : memref<1x128xf32, #tpu.memory_space<vmem>>, vector<1x128xf32>
    %313 = vector.broadcast %312 : vector<1x128xf32> to vector<8x128xf32>
    %314 = arith.addf %311, %313 : vector<8x128xf32>
    %cst_83 = arith.constant 0.000000e+00 : f32
    %315 = vector.broadcast %cst_83 : f32 to vector<8x128xf32>
    %316 = arith.maximumf %314, %315 : vector<8x128xf32>
    %c0_84 = arith.constant 0 : index
    %c0_85 = arith.constant 0 : index
    %317 = vector.load %arg9[%c0_84, %c0_85] : memref<128x128xf32, #tpu.memory_space<vmem>>, vector<128x128xf32>
    %cst_86 = arith.constant dense<0.000000e+00> : vector<8x128xf32>
    %318 = tpu.matmul %316, %317, %cst_86 {dimension_numbers = #tpu.dot_dimension_numbers<[1], [0], [0], [1], [0, 0, 1, 1], [], []>} : vector<8x128xf32>, vector<128x128xf32>, vector<8x128xf32> -> vector<8x128xf32>
    %c0_87 = arith.constant 0 : index
    %c0_88 = arith.constant 0 : index
    %319 = vector.load %arg10[%c0_87, %c0_88] : memref<1x128xf32, #tpu.memory_space<vmem>>, vector<1x128xf32>
    %320 = vector.broadcast %319 : vector<1x128xf32> to vector<8x128xf32>
    %321 = arith.addf %318, %320 : vector<8x128xf32>
    %c0_89 = arith.constant 0 : index
    %c0_90 = arith.constant 0 : index
    %322 = vector.load %arg2[%c0_89, %c0_90] : memref<8x128xf32, #tpu.memory_space<vmem>>, vector<8x128xf32>
    %323 = arith.addf %321, %322 : vector<8x128xf32>
    %cst_91 = arith.constant dense<0xFF800000> : vector<8xf32>
    %324 = vector.multi_reduction <maximumf>, %323, %cst_91 [1] : vector<8x128xf32> to vector<8xf32>
    %325 = vector.shape_cast %324 : vector<8xf32> to vector<8x1xf32>
    %326 = vector.broadcast %325 : vector<8x1xf32> to vector<8x128xf32>
    %327 = arith.subf %323, %326 : vector<8x128xf32>
    %328 = math.exp %327 : vector<8x128xf32>
    %cst_92 = arith.constant dense<0.000000e+00> : vector<8xf32>
    %329 = vector.multi_reduction <add>, %328, %cst_92 [1] : vector<8x128xf32> to vector<8xf32>
    %330 = vector.shape_cast %329 : vector<8xf32> to vector<8x1xf32>
    %331 = vector.broadcast %330 : vector<8x1xf32> to vector<8x128xf32>
    %332 = arith.divf %328, %331 : vector<8x128xf32>
    %c0_93 = arith.constant 0 : index
    %c0_94 = arith.constant 0 : index
    %333 = vector.load %arg11[%c0_93, %c0_94] : memref<8x128xf32, #tpu.memory_space<vmem>>, vector<8x128xf32>
    tpu.vector_store %arg11[%c0_93, %c0_94], %332 {strides = array<i32>} : memref<8x128xf32, #tpu.memory_space<vmem>>, vector<8x128xf32>,
    return
  }
}

</mosaic_0001>

<bundles_post_ra>
// kernel: tpu_custom_call.1
= control target key start
LH: loop header
LB: loop body
LE: loop exit
PB: predicated region body
PF: predicated region fallthrough
CT: control target
= control target key end

     0   :  { %16 = vsyncpa [#allocation4], 0  ;;  %s4043_s0 = inlined_call_operand.vmem [shape: f32[8,8,128], index: 0, kind: input, shape index: {}]   ;;  %s4044_s1 = inlined_call_operand.vmem [shape: f32[8,8,1], index: 1, kind: input, shape index: {}]   ;;  %s4045_s2 = inlined_call_operand.vmem [shape: f32[8,128], index: 2, kind: input, shape index: {}]   ;;  %s4046_s3 = inlined_call_operand.hbm [shape: f32[128,384], index: 3, kind: input, shape index: {}]   ;;  %s4047_s4 = inlined_call_operand.hbm [shape: f32[128,384], index: 4, kind: input, shape index: {}]   ;;  %s4048_s5 = inlined_call_operand.vmem [shape: f32[1,384], index: 5, kind: input, shape index: {}]   ;;  %s4049_s6 = inlined_call_operand.vmem [shape: f32[1,384], index: 6, kind: input, shape index: {}]   ;;  %s4050_s7 = inlined_call_operand.hbm [shape: f32[128,128], index: 7, kind: input, shape index: {}]   ;;  %s4051_s8 = inlined_call_operand.vmem [shape: f32[1,128], index: 8, kind: input, shape index: {}]   ;;  %s4052_s9 = inlined_call_operand.hbm [shape: f32[128,128], index: 9, kind: input, shape index: {}]   ;;  %s4053_s10 = inlined_call_operand.vmem [shape: f32[1,128], index: 10, kind: input, shape index: {}]   ;;  %s4054_s11 = inlined_call_operand.hbm [shape: f32[8,128], index: 11, kind: output, shape index: {}]  }
   0x1   :  { %17 = vsyncpa [#allocation7], 0 }
   0x2   :  { %18 = vsyncpa [#allocation10], 0 }
   0x3   :  { %19 = vsyncpa [#allocation5], 0  ;;  %s2955_s17 = smov [#allocation6]   ;;  %s2956_s19 = smov [#allocation3]  }
   0x4   :  { %s43_s18 = sshll.u32 %s2955_s17, 4  ;;  %s31_s20 = sshll.u32 %s2956_s19, 4  ;;  %s44_s18 = int_to_ptr.vmem [resolvable:$true] %s43_s18  ;;  %s32_s20 = int_to_ptr.vmem [resolvable:$true] %s31_s20 }
   0x5   :  { %s2855_s21 = scalar_lea.vmem %s44_s18, 6144  ;;  %p2860_p1 = scmp.lt.s32.totalorder %s44_s18, %s44_s18 }
   0x6   :  { %p2856_p0 = scmp.ne.s32.totalorder %s44_s18, %s2855_s21  ;;  %p2861_p2 = scmp.lt.s32.totalorder %s2855_s21, %s2855_s21 }
   0x8   :  { %p2862_p3 = por %p2861_p2, %p2860_p1 }
   0xa   :  { %p2863_p4 = pnand %p2862_p3, %p2856_p0 }
   0xc   :  { %2866 = shalt.err (!%p2863_p4)
}
   0xd   :  { %s2957_s22 = smov 384   ;;  %s2958_s23 = smov 24  }
   0xe   :  { %49 = dma.hbm_to_vmem [thread:$0]  %s4047_s4, 6144, %s44_s18, [#allocation7], %s2957_s22, %s2957_s22, %s2958_s23  }
   0xf   :  { %s2875_s26 = scalar_lea.vmem %s32_s20, 6144  ;;  %p2880_p6 = scmp.lt.s32.totalorder %s32_s20, %s32_s20 }
  0x10   :  { %p2876_p5 = scmp.ne.s32.totalorder %s32_s20, %s2875_s26  ;;  %p2881_p7 = scmp.lt.s32.totalorder %s2875_s26, %s2875_s26 }
  0x12   :  { %p2882_p8 = por %p2881_p7, %p2880_p6 }
  0x14   :  { %p2883_p9 = pnand %p2882_p8, %p2876_p5 }
  0x16   :  { %2886 = shalt.err (!%p2883_p9)
}
  0x17   :  { %37 = dma.hbm_to_vmem [thread:$0]  %s4046_s3, 6144, %s32_s20, [#allocation4], %s2957_s22, %s2957_s22, %s2958_s23  }
  0x18   :  { %s2959_s29 = smov [#allocation8]  }
  0x19   :  { %s59_s30 = sshll.u32 %s2959_s29, 4  ;;  %s60_s30 = int_to_ptr.vmem [resolvable:$true] %s59_s30 }
  0x1a   :  { %s2895_s12 = scalar_lea.vmem %s60_s30, 2048  ;;  %p2900_p11 = scmp.lt.s32.totalorder %s60_s30, %s60_s30 }
  0x1b   :  { %p2896_p10 = scmp.ne.s32.totalorder %s60_s30, %s2895_s12  ;;  %p2901_p12 = scmp.lt.s32.totalorder %s2895_s12, %s2895_s12 }
  0x1d   :  { %p2902_p13 = por %p2901_p12, %p2900_p11 }
  0x1f   :  { %p2903_p0 = pnand %p2902_p13, %p2896_p10 }
  0x21   :  { %2906 = shalt.err (!%p2903_p0)
}
  0x22   :  { %s2960_s4 = smov 128   ;;  %s2961_s13 = smov 8  }
  0x23   :  { %65 = dma.hbm_to_vmem [thread:$0]  %s4050_s7, 2048, %s60_s30, [#allocation7], %s2960_s4, %s2960_s4, %s2961_s13  }
  0x24   :  { %s2962_s16 = smov [#allocation9]  }
  0x25   :  { %s73_s17 = sshll.u32 %s2962_s16, 4  ;;  %s74_s17 = int_to_ptr.vmem [resolvable:$true] %s73_s17 }
  0x26   :  { %s2915_s3 = scalar_lea.vmem %s74_s17, 2048  ;;  %p2920_p2 = scmp.lt.s32.totalorder %s74_s17, %s74_s17 }
  0x27   :  { %p2916_p1 = scmp.ne.s32.totalorder %s74_s17, %s2915_s3  ;;  %p2921_p3 = scmp.lt.s32.totalorder %s2915_s3, %s2915_s3 }
  0x29   :  { %p2922_p4 = por %p2921_p3, %p2920_p2 }
  0x2b   :  { %p2923_p5 = pnand %p2922_p4, %p2916_p1 }
  0x2d   :  { %2926 = shalt.err (!%p2923_p5)
}
  0x2e   :  { %79 = dma.hbm_to_vmem [thread:$0]  %s4052_s9, 2048, %s74_s17, [#allocation10], %s2960_s4, %s2960_s4, %s2961_s13  }
  0x2f   :  { %2947 = dma.done.wait [#allocation4], 6144  }
  0x30   :  { %2948 = vsyncadd [#allocation4], 4294961152 }
  0x31   :  { %2949 = dma.done.wait [#allocation7], 8192  }
  0x32   :  { %2950 = vsyncadd [#allocation7], 4294959104 }
  0x33   :  { %2951 = dma.done.wait [#allocation10], 2048  }
  0x34   :  { %2952 = vsyncadd [#allocation10], 4294965248  ;;  %v4055_v0 = vmov 0.0   ;;  %v2964_v1 = vmov 0   ;;  %v148_v2 = vld [vmem:[#allocation3 + $0x170] sm:$0xff]  ;;  %v147_v3 = vld [vmem:[#allocation3 + $0x168] sm:$0xff] }
  0x35   :  { %231 = vmatprep.mubr.f32.mxu0 %v4055_v0  ;;  %2713 = vset.pattern.permute.xlu0 %v2964_v1  ;;  %v145_v4 = vld [vmem:[#allocation3 + $0x158] sm:$0xff]  ;;  %v144_v5 = vld [vmem:[#allocation3 + $0x150] sm:$0xff]  ;;  %v142_v6 = vld [vmem:[#allocation3 + $0x140] sm:$0xff]  ;;  %vm2965_vm0 = vmmov 0  }
  0x36   :  { %2714 = vset.pattern.permute.xlu1 %v2964_v1  ;;  %167 = vmatprep.subr.mxu0 %v148_v2  ;;  %v141_v7 = vld [vmem:[#allocation3 + $0x138] sm:$0xff]  ;;  %v139_v8 = vld [vmem:[#allocation3 + $0x128] sm:$0xff]  ;;  %v138_v9 = vld [vmem:[#allocation3 + $0x120] sm:$0xff] }
  0x37   :  { %168 = vmatpush1.msra.mxu0 %v147_v3  ;;  %v136_v10 = vld [vmem:[#allocation3 + $0x110] sm:$0xff]  ;;  %v135_v11 = vld [vmem:[#allocation3 + $0x108] sm:$0xff]  ;;  %v133_v12 = vld [vmem:[#allocation3 + $0xf8] sm:$0xff] }
  0x38   :  { %169 = vmatprep.subr.mxu0 %v145_v4  ;;  %v132_v13 = vld [vmem:[#allocation3 + $0xf0] sm:$0xff]  ;;  %v130_v14 = vld [vmem:[#allocation3 + $0xe0] sm:$0xff]  ;;  %v129_v16 = vld [vmem:[#allocation3 + $0xd8] sm:$0xff] }
  0x39   :  { %170 = vmatpush1.msra.mxu0 %v144_v5  ;;  %v3043_v15 = vld [vmem:[%s4043_s0] sm:$0xff]  ;;  %v149_v17 = vld [vmem:[#allocation3 + $0x178] sm:$0xff]  ;;  %v127_v18 = vld [vmem:[#allocation3 + $0xc8] sm:$0xff] }
  0x3a   :  { %171 = vmatprep.subr.mxu0 %v142_v6  ;;  %2339 = vmatprep.mubr.f32.mxu1 %v3043_v15  ;;  %v146_v19 = vld [vmem:[#allocation3 + $0x160] sm:$0xff]  ;;  %v143_v21 = vld [vmem:[#allocation3 + $0x148] sm:$0xff]  ;;  %v124_v22 = vld [vmem:[#allocation3 + $0xb0] sm:$0xff] }
  0x3b   :  { %172 = vmatpush1.msra.mxu0 %v141_v7  ;;  %2307 = vmatprep.subr.mxu1 %v149_v17  ;;  %v126_v20 = vld [vmem:[#allocation3 + $0xc0] sm:$0xff]  ;;  %v123_v23 = vld [vmem:[#allocation3 + $0xa8] sm:$0xff]  ;;  %v140_v24 = vld [vmem:[#allocation3 + $0x130] sm:$0xff] }
  0x3c   :  { %173 = vmatprep.subr.mxu0 %v139_v8  ;;  %2308 = vmatpush3.msra.mxu1 %v149_v17  ;;  %v121_v25 = vld [vmem:[#allocation3 + $0x98] sm:$0xff]  ;;  %v120_v26 = vld [vmem:[#allocation3 + $0x90] sm:$0xff]  ;;  %v118_v28 = vld [vmem:[#allocation3 + $0x80] sm:$0xff] }
  0x3d   :  { %174 = vmatpush1.msra.mxu0 %v138_v9  ;;  %2309 = vmatprep.subr.mxu1 %v146_v19  ;;  %v137_v27 = vld [vmem:[#allocation3 + $0x118] sm:$0xff]  ;;  %v134_v30 = vld [vmem:[#allocation3 + $0x100] sm:$0xff]  ;;  %v115_v31 = vld [vmem:[#allocation3 + $0x68] sm:$0xff] }
  0x3e   :  { %175 = vmatprep.subr.mxu0 %v136_v10  ;;  %2310 = vmatpush3.msra.mxu1 %v146_v19  ;;  %v117_v29 = vld [vmem:[#allocation3 + $0x78] sm:$0xff]  ;;  %v114_v32 = vld [vmem:[#allocation3 + $0x60] sm:$0xff]  ;;  %v131_v33 = vld [vmem:[#allocation3 + $0xe8] sm:$0xff] }
  0x3f   :  { %176 = vmatpush1.msra.mxu0 %v135_v11  ;;  %2311 = vmatprep.subr.mxu1 %v143_v21  ;;  %v112_v34 = vld [vmem:[#allocation3 + $0x50] sm:$0xff]  ;;  %v111_v35 = vld [vmem:[#allocation3 + $0x48] sm:$0xff]  ;;  %v109_v37 = vld [vmem:[#allocation3 + $0x38] sm:$0xff] }
  0x40   :  { %177 = vmatprep.subr.mxu0 %v133_v12  ;;  %2312 = vmatpush3.msra.mxu1 %v143_v21  ;;  %v128_v36 = vld [vmem:[#allocation3 + $0xd0] sm:$0xff]  ;;  %v125_v39 = vld [vmem:[#allocation3 + $0xb8] sm:$0xff]  ;;  %v106_v40 = vld [vmem:[#allocation3 + $0x20] sm:$0xff] }
  0x41   :  { %178 = vmatpush1.msra.mxu0 %v132_v13  ;;  %2313 = vmatprep.subr.mxu1 %v140_v24  ;;  %v108_v38 = vld [vmem:[#allocation3 + $0x30] sm:$0xff]  ;;  %v105_v41 = vld [vmem:[#allocation3 + $0x18] sm:$0xff]  ;;  %v122_v42 = vld [vmem:[#allocation3 + $0xa0] sm:$0xff] }
  0x42   :  { %179 = vmatprep.subr.mxu0 %v130_v14  ;;  %2314 = vmatpush3.msra.mxu1 %v140_v24  ;;  %v103_v43 = vld [vmem:[#allocation3 + $0x8] sm:$0xff]  ;;  %v102_v44 = vld [vmem:[#allocation3] sm:$0xff]  ;;  %v3046_v46 = vld [vmem:[#allocation6 + $0x170] sm:$0xff] }
  0x43   :  { %180 = vmatpush1.msra.mxu0 %v129_v16  ;;  %2315 = vmatprep.subr.mxu1 %v137_v27  ;;  %v119_v45 = vld [vmem:[#allocation3 + $0x88] sm:$0xff]  ;;  %4091 = vst [vmem:[#allocation16_spill] sm:$0xff] %v3046_v46  ;;  %v3050_v48 = vld [vmem:[#allocation6 + $0x158] sm:$0xff]  ;;  %v3054_v49 = vld [vmem:[#allocation6 + $0x150] sm:$0xff] }
  0x44   :  { %181 = vmatprep.subr.mxu0 %v127_v18  ;;  %2316 = vmatpush3.msra.mxu1 %v137_v27  ;;  %v3048_v47 = vld [vmem:[#allocation6 + $0x168] sm:$0xff]  ;;  %v116_v50 = vld [vmem:[#allocation3 + $0x70] sm:$0xff]  ;;  %v3063_v52 = vld [vmem:[#allocation6 + $0x140] sm:$0xff] }
  0x45   :  { %182 = vmatpush1.msra.mxu0 %v126_v20  ;;  %2317 = vmatprep.subr.mxu1 %v134_v30  ;;  %v3061_v51 = vld [vmem:[%s4043_s0 + $0x8] sm:$0xff]  ;;  %v3066_v53 = vld [vmem:[#allocation6 + $0x138] sm:$0xff]  ;;  %v3073_v55 = vld [vmem:[#allocation6 + $0x120] sm:$0xff] }
  0x46   :  { %183 = vmatprep.subr.mxu0 %v124_v22  ;;  %2318 = vmatpush3.msra.mxu1 %v134_v30  ;;  %v3069_v54 = vld [vmem:[#allocation6 + $0x128] sm:$0xff]  ;;  %v113_v56 = vld [vmem:[#allocation3 + $0x58] sm:$0xff]  ;;  %v3080_v57 = vld [vmem:[%s4043_s0 + $0x10] sm:$0xff] }
  0x47   :  { %184 = vmatpush1.msra.mxu0 %v123_v23  ;;  %2319 = vmatprep.subr.mxu1 %v131_v33  ;;  %v3082_v58 = vld [vmem:[#allocation6 + $0x110] sm:$0xff]  ;;  %v3085_v59 = vld [vmem:[#allocation6 + $0x108] sm:$0xff]  ;;  %v3088_v60 = vld [vmem:[#allocation6 + $0xf8] sm:$0xff] }
  0x48   :  { %185 = vmatprep.subr.mxu0 %v121_v25  ;;  %2320 = vmatpush3.msra.mxu1 %v131_v33  ;;  %v3092_v61 = vld [vmem:[#allocation6 + $0xf0] sm:$0xff]  ;;  %v110_v62 = vld [vmem:[#allocation3 + $0x40] sm:$0xff]  ;;  %v3099_v63 = vld [vmem:[%s4043_s0 + $0x18] sm:$0xff] }
  0x49   :  { %186 = vmatpush1.msra.mxu0 %v120_v26  ;;  %2321 = vmatprep.subr.mxu1 %v128_v36  ;;  %v3101_v1 = vld [vmem:[#allocation6 + $0xe0] sm:$0xff]  ;;  %v3104_v2 = vld [vmem:[#allocation6 + $0xd8] sm:$0xff]  ;;  %v3107_v3 = vld [vmem:[#allocation6 + $0xc8] sm:$0xff] }
  0x4a   :  { %187 = vmatprep.subr.mxu0 %v118_v28  ;;  %2322 = vmatpush3.msra.mxu1 %v128_v36  ;;  %v3111_v4 = vld [vmem:[#allocation6 + $0xc0] sm:$0xff]  ;;  %v107_v5 = vld [vmem:[#allocation3 + $0x28] sm:$0xff]  ;;  %v3120_v7 = vld [vmem:[#allocation6 + $0xb0] sm:$0xff] }
  0x4b   :  { %188 = vmatpush1.msra.mxu0 %v117_v29  ;;  %2323 = vmatprep.subr.mxu1 %v125_v39  ;;  %v3118_v6 = vld [vmem:[%s4043_s0 + $0x20] sm:$0xff]  ;;  %v3123_v8 = vld [vmem:[#allocation6 + $0xa8] sm:$0xff]  ;;  %v3126_v9 = vld [vmem:[#allocation6 + $0x98] sm:$0xff] }
  0x4c   :  { %189 = vmatprep.subr.mxu0 %v115_v31  ;;  %2324 = vmatpush3.msra.mxu1 %v125_v39  ;;  %v3130_v10 = vld [vmem:[#allocation6 + $0x90] sm:$0xff]  ;;  %v3137_v12 = vld [vmem:[%s4043_s0 + $0x28] sm:$0xff]  ;;  %v3139_v13 = vld [vmem:[#allocation6 + $0x80] sm:$0xff] }
  0x4d   :  { %190 = vmatpush1.msra.mxu0 %v114_v32  ;;  %2325 = vmatprep.subr.mxu1 %v122_v42  ;;  %v104_v11 = vld [vmem:[#allocation3 + $0x10] sm:$0xff]  ;;  %v3142_v14 = vld [vmem:[#allocation6 + $0x78] sm:$0xff]  ;;  %v3149_v16 = vld [vmem:[#allocation6 + $0x60] sm:$0xff] }
  0x4e   :  { %191 = vmatprep.subr.mxu0 %v112_v34  ;;  %2326 = vmatpush3.msra.mxu1 %v122_v42  ;;  %v100_v17 = vld [vmem:[%s4043_s0 + $0x30] sm:$0xff]  ;;  %v3159_v19 = vld [vmem:[#allocation6 + $0x48] sm:$0xff]  ;;  %v3162_v20 = vld [vmem:[#allocation6 + $0x38] sm:$0xff] }
  0x4f   :  { %192 = vmatpush1.msra.mxu0 %v111_v35  ;;  %2327 = vmatprep.subr.mxu1 %v119_v45  ;;  %v3156_v18 = vld [vmem:[#allocation6 + $0x50] sm:$0xff]  ;;  %v3168_v22 = vld [vmem:[#allocation6 + $0x178] sm:$0xff]  ;;  %v3175_v24 = vld [vmem:[#allocation6 + $0x20] sm:$0xff] }
  0x50   :  { %193 = vmatprep.subr.mxu0 %v109_v37  ;;  %2328 = vmatpush3.msra.mxu1 %v119_v45  ;;  %v3166_v21 = vld [vmem:[#allocation6 + $0x30] sm:$0xff]  ;;  %v101_v23 = vld [vmem:[%s4043_s0 + $0x38] sm:$0xff]  ;;  %4093 = vst [vmem:[#allocation18_spill] sm:$0xff] %v3175_v24  ;;  %v3182_v26 = vld [vmem:[#allocation6 + $0x8] sm:$0xff]  ;;  %v152_v45 = vlaneseq }
  0x51   :  { %194 = vmatpush1.msra.mxu0 %v108_v38  ;;  %2329 = vmatprep.subr.mxu1 %v116_v50  ;;  %4092 = vst [vmem:[#allocation17_spill] sm:$0xff] %v3166_v21  ;;  %v3178_v25 = vld [vmem:[#allocation6 + $0x18] sm:$0xff]  ;;  %4095 = vst [vmem:[#allocation20_spill] sm:$0xff] %v3182_v26  ;;  %v3186_v27 = vld [vmem:[#allocation6] sm:$0xff] }
  0x52   :  { %195 = vmatprep.subr.mxu0 %v106_v40  ;;  %2330 = vmatpush3.msra.mxu1 %v116_v50  ;;  %4094 = vst [vmem:[#allocation19_spill] sm:$0xff] %v3178_v25  ;;  %4096 = vst [vmem:[#allocation21_spill] sm:$0xff] %v3186_v27  ;;  %v3188_v28 = vld [vmem:[#allocation6 + $0x160] sm:$0xff]  ;;  %v3194_v29 = vld [vmem:[#allocation6 + $0x148] sm:$0xff]  ;;  %v3335_v50 = vshrl.u32 %v152_v45, 7 }
  0x53   :  { %196 = vmatpush1.msra.mxu0 %v105_v41  ;;  %2331 = vmatprep.subr.mxu1 %v113_v56  ;;  %v3200_v30 = vld [vmem:[#allocation6 + $0x130] sm:$0xff]  ;;  %v639_v31 = vld [vmem:[%s4044_s1] sm:$0xff]  ;;  %v3208_v32 = vld [vmem:[#allocation6 + $0x118] sm:$0xff] }
  0x54   :  { %197 = vmatprep.subr.mxu0 %v103_v43  ;;  %2332 = vmatpush3.msra.mxu1 %v113_v56  ;;  %v3214_v33 = vld [vmem:[#allocation6 + $0x100] sm:$0xff]  ;;  %v3219_v34 = vld [vmem:[#allocation6 + $0xe8] sm:$0xff]  ;;  %v3224_v35 = vld [vmem:[#allocation6 + $0xd0] sm:$0xff] }
  0x55   :  { %198 = vmatpush1.msra.mxu0 %v102_v44  ;;  %2333 = vmatprep.subr.mxu1 %v110_v62  ;;  %v3230_v36 = vld [vmem:[#allocation6 + $0xb8] sm:$0xff]  ;;  %v3236_v37 = vld [vmem:[#allocation6 + $0xa0] sm:$0xff]  ;;  %v3242_v38 = vld [vmem:[#allocation6 + $0x88] sm:$0xff] }
  0x56   :  { %232 = vmatmul.mubr.f32.vlgmr.msra.gmra.mxu0 %v3043_v15  ;;  %477 = vmatprep.subr.mxu0 %v3046_v46  ;;  %v3145_v15 = vld [vmem:[#allocation6 + $0x68] sm:$0xff]  ;;  %v3248_v39 = vld [vmem:[#allocation6 + $0x70] sm:$0xff]  ;;  %v3254_v40 = vld [vmem:[#allocation6 + $0x58] sm:$0xff] }
  0x57   :  { %478 = vmatpush1.msra.mxu0 %v3048_v47  ;;  %237 = vmatprep.mubr.f32.mxu0 %v4055_v0  ;;  %v3260_v41 = vld [vmem:[#allocation6 + $0x40] sm:$0xff]  ;;  %v3266_v42 = vld [vmem:[#allocation6 + $0x28] sm:$0xff]  ;;  %v3272_v43 = vld [vmem:[#allocation6 + $0x10] sm:$0xff] }
  0x58   :  { %479 = vmatprep.subr.mxu0 %v3050_v48  ;;  %2334 = vmatpush3.msra.mxu1 %v110_v62  ;;  %4097 = vst [vmem:[#allocation22_spill] sm:$0xff] %v3260_v41  ;;  %4098 = vst [vmem:[#allocation23_spill] sm:$0xff] %v3266_v42  ;;  %v2092_v44 = vld [vmem:[%s4044_s1 + $0x8] sm:$0xff]  ;;  %v150_v56 = vld [vmem:[%s4048_s5] sm:$0x7]  ;;  %v158_v62 = vsub.s32 1, %v3335_v50 }
  0x59   :  { %480 = vmatpush1.msra.mxu0 %v3054_v49  ;;  %2335 = vmatprep.subr.mxu1 %v107_v5  ;;  %4099 = vst [vmem:[#allocation24_spill] sm:$0xff] %v3272_v43 }
  0x5a   :  { %238 = vmatmul.mubr.f32.gmra.mxu0 %v3061_v51  ;;  %481 = vmatprep.subr.mxu0 %v3063_v52 }
  0x5b   :  { %482 = vmatpush1.msra.mxu0 %v3066_v53  ;;  %243 = vmatprep.mubr.f32.mxu0 %v4055_v0 }
  0x5c   :  { %483 = vmatprep.subr.mxu0 %v3069_v54  ;;  %2336 = vmatpush3.msra.mxu1 %v107_v5 }
  0x5d   :  { %484 = vmatpush1.msra.mxu0 %v3073_v55  ;;  %2337 = vmatprep.subr.mxu1 %v104_v11 }
  0x5e   :  { %244 = vmatmul.mubr.f32.gmra.mxu0 %v3080_v57  ;;  %485 = vmatprep.subr.mxu0 %v3082_v58 }
  0x5f   :  { %486 = vmatpush1.msra.mxu0 %v3085_v59  ;;  %249 = vmatprep.mubr.f32.mxu0 %v4055_v0 }
  0x60   :  { %487 = vmatprep.subr.mxu0 %v3088_v60  ;;  %2338 = vmatpush3.msra.mxu1 %v104_v11  ;;  %v159_v11 = vrot.slane %v150_v56, %v158_v62 }
  0x61   :  { %488 = vmatpush1.msra.mxu0 %v3092_v61  ;;  %2351 = vmatprep.subr.mxu1 %v4055_v0 }
  0x62   :  { %250 = vmatmul.mubr.f32.gmra.mxu0 %v3099_v63  ;;  %489 = vmatprep.subr.mxu0 %v3101_v1 }
  0x63   :  { %490 = vmatpush1.msra.mxu0 %v3104_v2  ;;  %255 = vmatprep.mubr.f32.mxu0 %v4055_v0 }
  0x64   :  { %491 = vmatprep.subr.mxu0 %v3107_v3  ;;  %2340 = vmatmul.mubr.f32.vlgmr.msra.gmra.mxu1 %v3061_v51  ;;  %v154_v51 = vsub.s32 0, %v3335_v50 }
  0x65   :  { %492 = vmatpush1.msra.mxu0 %v3111_v4  ;;  %2352 = vmatpush3.msra.mxu1 %v3168_v22 }
  0x66   :  { %256 = vmatmul.mubr.f32.gmra.mxu0 %v3118_v6  ;;  %493 = vmatprep.subr.mxu0 %v3120_v7  ;;  %v155_v5 = vrot.slane %v150_v56, %v154_v51 }
  0x67   :  { %494 = vmatpush1.msra.mxu0 %v3123_v8  ;;  %261 = vmatprep.mubr.f32.mxu0 %v4055_v0 }
  0x68   :  { %495 = vmatprep.subr.mxu0 %v3126_v9  ;;  %2353 = vmatprep.subr.mxu1 %v4055_v0 }
  0x69   :  { %496 = vmatpush1.msra.mxu0 %v3130_v10  ;;  %2354 = vmatpush3.msra.mxu1 %v3188_v28 }
  0x6a   :  { %262 = vmatmul.mubr.f32.gmra.mxu0 %v3137_v12  ;;  %497 = vmatprep.subr.mxu0 %v3139_v13 }
  0x6b   :  { %498 = vmatpush1.msra.mxu0 %v3142_v14  ;;  %267 = vmatprep.mubr.f32.mxu0 %v4055_v0 }
  0x6c   :  { %499 = vmatprep.subr.mxu0 %v3145_v15  ;;  %2355 = vmatprep.subr.mxu1 %v4055_v0 }
  0x6d   :  { %500 = vmatpush1.msra.mxu0 %v3149_v16  ;;  %2356 = vmatpush3.msra.mxu1 %v3194_v29 }
  0x6e   :  { %268 = vmatmul.mubr.f32.gmra.mxu0 %v100_v17  ;;  %501 = vmatprep.subr.mxu0 %v3156_v18 }
  0x6f   :  { %502 = vmatpush1.msra.mxu0 %v3159_v19  ;;  %273 = vmatprep.mubr.f32.mxu0 %v4055_v0 }
  0x70   :  { %503 = vmatprep.subr.mxu0 %v3162_v20  ;;  %2342 = vmatprep.mubr.f32.mxu1 %v3080_v57 }
  0x71   :  { %504 = vmatpush1.msra.mxu0 %v3166_v21  ;;  %2357 = vmatprep.subr.mxu1 %v4055_v0 }
  0x72   :  { %274 = vmatmul.mubr.f32.gmra.mxu0 %v101_v23  ;;  %505 = vmatprep.subr.mxu0 %v3175_v24 }
  0x73   :  { %506 = vmatpush1.msra.mxu0 %v3178_v25  ;;  %541 = vmatprep.mubr.f32.mxu0 %v4055_v0 }
  0x74   :  { %507 = vmatprep.subr.mxu0 %v3182_v26  ;;  %2343 = vmatmul.mubr.f32.gmra.mxu1 %v3099_v63 }
  0x75   :  { %508 = vmatpush1.msra.mxu0 %v3186_v27  ;;  %2358 = vmatpush3.msra.mxu1 %v3200_v30 }
  0x76   :  { %542 = vmatmul.mubr.f32.vlgmr.msra.gmra.mxu0 %v4055_v0  ;;  %2345 = vmatprep.mubr.f32.mxu1 %v3118_v6 }
  0x77   :  { %2359 = vmatprep.subr.mxu1 %v4055_v0  ;;  %642 = vperm.xlu0 %2713, %v639_v31  }
  0x78   :  { %2360 = vmatpush3.msra.mxu1 %v3208_v32  ;;  %651 = vmatprep.subr.mxu0 %v3046_v46 }
  0x79   :  { %2361 = vmatprep.subr.mxu1 %v4055_v0  ;;  %2346 = vmatmul.mubr.f32.gmra.mxu1 %v3137_v12 }
  0x7a   :  { %2362 = vmatpush3.msra.mxu1 %v3214_v33  ;;  %2348 = vmatprep.mubr.f32.mxu1 %v100_v17 }
  0x7b   :  { %2363 = vmatprep.subr.mxu1 %v4055_v0  ;;  %652 = vmatpush1.msra.mxu0 %v3048_v47 }
  0x7c   :  { %2364 = vmatpush3.msra.mxu1 %v3219_v34  ;;  %653 = vmatprep.subr.mxu0 %v3050_v48 }
  0x7d   :  { %2365 = vmatprep.subr.mxu1 %v4055_v0  ;;  %2349 = vmatmul.mubr.f32.gmra.mxu1 %v101_v23 }
  0x7e   :  { %2366 = vmatpush3.msra.mxu1 %v3224_v35  ;;  %2383 = vmatprep.mubr.msk.f32.mxu1 %vm2965_vm0, %v4055_v0 }
  0x7f   :  { %2367 = vmatprep.subr.mxu1 %v4055_v0  ;;  %654 = vmatpush1.msra.mxu0 %v3054_v49 }
  0x80   :  { %2368 = vmatpush3.msra.mxu1 %v3230_v36  ;;  %655 = vmatprep.subr.mxu0 %v3063_v52 }
  0x81   :  { %2369 = vmatprep.subr.mxu1 %v4055_v0  ;;  %656 = vmatpush1.msra.mxu0 %v3066_v53 }
  0x82   :  { %2370 = vmatpush3.msra.mxu1 %v3236_v37  ;;  %657 = vmatprep.subr.mxu0 %v3069_v54 }
  0x83   :  { %2371 = vmatprep.subr.mxu1 %v4055_v0  ;;  %658 = vmatpush1.msra.mxu0 %v3073_v55 }
  0x84   :  { %2372 = vmatpush3.msra.mxu1 %v3242_v38  ;;  %659 = vmatprep.subr.mxu0 %v3082_v58 }
  0x85   :  { %2373 = vmatprep.subr.mxu1 %v4055_v0  ;;  %660 = vmatpush1.msra.mxu0 %v3085_v59 }
  0x86   :  { %2374 = vmatpush3.msra.mxu1 %v3248_v39  ;;  %661 = vmatprep.subr.mxu0 %v3088_v60 }
  0x87   :  { %2375 = vmatprep.subr.mxu1 %v4055_v0  ;;  %662 = vmatpush1.msra.mxu0 %v3092_v61 }
  0x88   :  { %2376 = vmatpush3.msra.mxu1 %v3254_v40  ;;  %663 = vmatprep.subr.mxu0 %v3101_v1 }
  0x89   :  { %2377 = vmatprep.subr.mxu1 %v4055_v0  ;;  %664 = vmatpush1.msra.mxu0 %v3104_v2 }
  0x8a   :  { %2378 = vmatpush3.msra.mxu1 %v3260_v41  ;;  %665 = vmatprep.subr.mxu0 %v3107_v3 }
  0x8b   :  { %2379 = vmatprep.subr.mxu1 %v4055_v0  ;;  %666 = vmatpush1.msra.mxu0 %v3111_v4 }
  0x8c   :  { %2380 = vmatpush3.msra.mxu1 %v3266_v42  ;;  %667 = vmatprep.subr.mxu0 %v3120_v7 }
  0x8d   :  { %2381 = vmatprep.subr.mxu1 %v4055_v0  ;;  %668 = vmatpush1.msra.mxu0 %v3123_v8 }
  0x8e   :  { %2382 = vmatpush3.msra.mxu1 %v3272_v43  ;;  %669 = vmatprep.subr.mxu0 %v3126_v9 }
  0x8f   :  { %2384 = vmatmul.mubr.f32.vlgmr.msra.gmra.mxu1 %v4055_v0  ;;  %2386 = vmatprep.subr.mxu1 %v4055_v0 }
  0x90   :  { %2387 = vmatpush3.msra.mxu1 %v3168_v22  ;;  %670 = vmatpush1.msra.mxu0 %v3130_v10 }
  0x91   :  { %2388 = vmatprep.subr.mxu1 %v4055_v0  ;;  %671 = vmatprep.subr.mxu0 %v3139_v13 }
  0x92   :  { %2389 = vmatpush3.msra.mxu1 %v3188_v28  ;;  %672 = vmatpush1.msra.mxu0 %v3142_v14 }
  0x93   :  { %2390 = vmatprep.subr.mxu1 %v4055_v0  ;;  %673 = vmatprep.subr.mxu0 %v3145_v15 }
  0x94   :  { %2391 = vmatpush3.msra.mxu1 %v3194_v29  ;;  %674 = vmatpush1.msra.mxu0 %v3149_v16 }
  0x95   :  { %2392 = vmatprep.subr.mxu1 %v4055_v0  ;;  %675 = vmatprep.subr.mxu0 %v3156_v18 }
  0x96   :  { %2393 = vmatpush3.msra.mxu1 %v3200_v30  ;;  %676 = vmatpush1.msra.mxu0 %v3159_v19 }
  0x97   :  { %2394 = vmatprep.subr.mxu1 %v4055_v0  ;;  %677 = vmatprep.subr.mxu0 %v3162_v20 }
  0x98   :  { %2395 = vmatpush3.msra.mxu1 %v3208_v32  ;;  %678 = vmatpush1.msra.mxu0 %v3166_v21 }
  0x99   :  { %2396 = vmatprep.subr.mxu1 %v4055_v0  ;;  %679 = vmatprep.subr.mxu0 %v3175_v24 }
  0x9a   :  { %2397 = vmatpush3.msra.mxu1 %v3214_v33  ;;  %680 = vmatpush1.msra.mxu0 %v3178_v25 }
  0x9b   :  { %2398 = vmatprep.subr.mxu1 %v4055_v0  ;;  %681 = vmatprep.subr.mxu0 %v3182_v26 }
  0x9c   :  { %2399 = vmatpush3.msra.mxu1 %v3219_v34  ;;  %682 = vmatpush1.msra.mxu0 %v3186_v27 }
  0x9d   :  { %2400 = vmatprep.subr.mxu1 %v4055_v0  ;;  %715 = vmatprep.mubr.f32.mxu0 %v4055_v0 }
  0x9e   :  { %2401 = vmatpush3.msra.mxu1 %v3224_v35  ;;  %2418 = vmatprep.mubr.msk.f32.mxu1 %vm2965_vm0, %v4055_v0 }
  0x9f   :  { %2402 = vmatprep.subr.mxu1 %v4055_v0  ;;  %826 = vmatprep.subr.mxu0 %v3046_v46 }
  0xa0   :  { %2403 = vmatpush3.msra.mxu1 %v3230_v36  ;;  %817 = vperm.xlu0 %2713, %v2092_v44  }
  0xa1   :  { %2404 = vmatprep.subr.mxu1 %v4055_v0 }
  0xa2   :  { %2405 = vmatpush3.msra.mxu1 %v3236_v37 }
  0xa3   :  { %2406 = vmatprep.subr.mxu1 %v4055_v0 }
  0xa4   :  { %2407 = vmatpush3.msra.mxu1 %v3242_v38 }
  0xa5   :  { %2408 = vmatprep.subr.mxu1 %v4055_v0 }
  0xa6   :  { %2409 = vmatpush3.msra.mxu1 %v3248_v39 }
  0xa7   :  { %2410 = vmatprep.subr.mxu1 %v4055_v0 }
  0xa8   :  { %2411 = vmatpush3.msra.mxu1 %v3254_v40 }
  0xa9   :  { %2412 = vmatprep.subr.mxu1 %v4055_v0 }
  0xaa   :  { %2413 = vmatpush3.msra.mxu1 %v3260_v41 }
  0xab   :  { %2414 = vmatprep.subr.mxu1 %v4055_v0 }
  0xac   :  { %2415 = vmatpush3.msra.mxu1 %v3266_v42 }
  0xad   :  { %2416 = vmatprep.subr.mxu1 %v4055_v0 }
  0xae   :  { %2417 = vmatpush3.msra.mxu1 %v3272_v43 }
  0xaf   :  { %2421 = vmatprep.subr.mxu1 %v4055_v0 }
 0x116   :  { %v233_v57 = vpop.f32.mrf.mxu0 }
 0x118   :  { %v235_v63 = vpop.f32.mrf.mxu0 }
 0x11a   :  { %v239_v6 = vpop.f32.mrf.mxu0 }
 0x11b   :  { %v3342_v12 = vadd.f32 %v239_v6, %v155_v5 }
 0x11c   :  { %v241_v17 = vpop.f32.mrf.mxu0 }
 0x11d   :  { %4100 = vst [vmem:[#allocation25_spill] sm:$0xff] %v3342_v12  ;;  %v3344_v23 = vadd.f32 %v241_v17, %v159_v11  ;;  %v162_v17 = vsub.s32 2, %v3335_v50 }
 0x11e   :  { %v245_v31 = vpop.f32.mrf.mxu0 }
 0x11f   :  { %4101 = vst [vmem:[#allocation26_spill] sm:$0xff] %v3344_v23  ;;  %v3346_v44 = vadd.f32 %v245_v31, %v155_v5 }
 0x120   :  { %v247_v45 = vpop.f32.mrf.mxu0 }
 0x121   :  { %4102 = vst [vmem:[#allocation27_spill] sm:$0xff] %v3346_v44  ;;  %v3348_v0 = vadd.f32 %v247_v45, %v159_v11 }
 0x122   :  { %v251_v46 = vpop.f32.mrf.mxu0 }
 0x123   :  { %4103 = vst [vmem:[#allocation28_spill] sm:$0xff] %v3348_v0  ;;  %v3350_v43 = vadd.f32 %v251_v46, %v155_v5  ;;  %v163_v0 = vrot.slane %v150_v56, %v162_v17 }
 0x124   :  { %v253_v27 = vpop.f32.mrf.mxu0 }
 0x125   :  { %4104 = vst [vmem:[#allocation29_spill] sm:$0xff] %v3350_v43  ;;  %v3352_v26 = vadd.f32 %v253_v27, %v159_v11 }
 0x126   :  { %v257_v42 = vpop.f32.mrf.mxu0 }
 0x127   :  { %4105 = vst [vmem:[#allocation30_spill] sm:$0xff] %v3352_v26  ;;  %v3354_v25 = vadd.f32 %v257_v42, %v155_v5  ;;  %v457_v42 = vld [vmem:[%s4049_s6] sm:$0x7] }
 0x128   :  { %v259_v6 = vpop.f32.mrf.mxu0  ;;  %v3379_v24 = vrot.slane %v457_v42, %v158_v62 }
 0x129   :  { %4106 = vst [vmem:[#allocation31_spill] sm:$0xff] %v3354_v25  ;;  %v3356_v12 = vadd.f32 %v259_v6, %v159_v11  ;;  %v2341_v25 = vpop.f32.mrf.mxu1 }
 0x12a   :  { %v263_v23 = vpop.f32.mrf.mxu0 }
 0x12b   :  { %4107 = vst [vmem:[#allocation32_spill] sm:$0xff] %v3356_v12  ;;  %v3359_v31 = vadd.f32 %v263_v23, %v155_v5  ;;  %v3370_v12 = vadd.f32 %v2341_v25, %v163_v0 }
 0x12c   :  { %v265_v44 = vpop.f32.mrf.mxu0 }
 0x12d   :  { %4108 = vst [vmem:[#allocation33_spill] sm:$0xff] %v3359_v31  ;;  %v3361_v45 = vadd.f32 %v265_v44, %v159_v11  ;;  %4112 = vst [vmem:[#allocation37_spill] sm:$0xff] %v3370_v12  ;;  %v3374_v31 = vrot.slane %v457_v42, %v154_v51 }
 0x12e   :  { %v269_v46 = vpop.f32.mrf.mxu0 }
 0x12f   :  { %4109 = vst [vmem:[#allocation34_spill] sm:$0xff] %v3361_v45  ;;  %v3363_v43 = vadd.f32 %v269_v46, %v155_v5  ;;  %4114 = vst [vmem:[#allocation39_spill] sm:$0xff] %v3374_v31  ;;  %v234_v45 = vadd.f32 %v233_v57, %v155_v5 }
 0x130   :  { %v271_v27 = vpop.f32.mrf.mxu0 }
 0x131   :  { %4110 = vst [vmem:[#allocation35_spill] sm:$0xff] %v3363_v43  ;;  %v3368_v6 = vadd.f32 %v271_v27, %v159_v11  ;;  %v346_v43 = vpop.f32.mrf.mxu1 }
 0x132   :  { %v275_v50 = vpop.f32.mrf.mxu0 }
 0x133   :  { %4111 = vst [vmem:[#allocation36_spill] sm:$0xff] %v3368_v6  ;;  %v3372_v23 = vadd.f32 %v275_v50, %v155_v5 }
 0x134   :  { %v277_v44 = vpop.f32.mrf.mxu0  ;;  %v2344_v27 = vpop.f32.mrf.mxu1 }
 0x135   :  { %4113 = vst [vmem:[#allocation38_spill] sm:$0xff] %v3372_v23  ;;  %v3376_v56 = vadd.f32 %v277_v44, %v159_v11  ;;  %v3381_v25 = vadd.f32 %v2344_v27, %v163_v0 }
 0x136   :  { %v543_v46 = vpop.f32.mrf.mxu0  ;;  %v356_v12 = vpop.f32.mrf.mxu1 }
 0x137   :  { %4115 = vst [vmem:[#allocation40_spill] sm:$0xff] %v3376_v56  ;;  %v544_v26 = vadd.f32 %v543_v46, %v3374_v31  ;;  %4116 = vst [vmem:[#allocation41_spill] sm:$0xff] %v3381_v25  ;;  %v3384_v23 = vadd.f32 %v356_v12, %v163_v0  ;;  %v236_v56 = vadd.f32 %v235_v63, %v159_v11 }
 0x138   :  { %v545_v41 = vpop.f32.mrf.mxu0  ;;  %v3394_v63 = vrot.slane %v457_v42, %v162_v17  ;;  %v4125_v17 = vld [vmem:[#allocation22_spill] sm:$0xff]  ;;  %v4127_v42 = vld [vmem:[#allocation19_spill] sm:$0xff] }
 0x139   :  { %v618_v6 = vadd.f32 %v544_v26, %v234_v45  ;;  %v546_v51 = vadd.f32 %v545_v41, %v3379_v24  ;;  %4117 = vst [vmem:[#allocation42_spill] sm:$0xff] %v3384_v23  ;;  %v2347_v44 = vpop.f32.mrf.mxu1  ;;  %v4135_v23 = vld [vmem:[#allocation26_spill] sm:$0xff] }
 0x13a   :  { %v3386_v21 = vadd.f32 %v2347_v44, %v163_v0 }
 0x13b   :  { %v2088_v50 = vmul.f32 -1.442695, %v618_v6  ;;  %v366_v57 = vpop.f32.mrf.mxu1  ;;  %v625_v5 = vadd.f32 %v546_v51, %v236_v56 }
 0x13c   :  { %4118 = vst [vmem:[#allocation43_spill] sm:$0xff] %v3386_v21  ;;  %v3388_v62 = vadd.f32 %v366_v57, %v163_v0  ;;  %v347_v57 = vadd.f32 %v346_v43, %v163_v0  ;;  %v4124_v43 = vld [vmem:[#allocation17_spill] sm:$0xff] }
 0x13d   :  { %2715 = vpow2.f32 %v2088_v50  ;;  %v2350_v46 = vpop.f32.mrf.mxu1  ;;  %v2089_v45 = vmul.f32 -1.442695, %v625_v5 }
 0x13e   :  { %4119 = vst [vmem:[#allocation44_spill] sm:$0xff] %v3388_v62  ;;  %v3390_v31 = vadd.f32 %v2350_v46, %v163_v0 }
 0x13f   :  { %v376_v26 = vpop.f32.mrf.mxu1  ;;  %2717 = vpow2.f32 %v2089_v45 }
 0x140   :  { %4120 = vst [vmem:[#allocation45_spill] sm:$0xff] %v3390_v31  ;;  %v3392_v27 = vadd.f32 %v376_v26, %v163_v0  ;;  %v4123_v0 = vmov 0.0  }
 0x142   :  { %4121 = vst [vmem:[#allocation46_spill] sm:$0xff] %v3392_v27 }
 0x14a   :  { %v2716_v41 = vpop.eup %2715 }
 0x14b   :  { %v622_v12 = vadd.f32 1.0, %v2716_v41 }
 0x14c   :  { %v2718_v11 = vpop.eup %2717 }
 0x14d   :  { %2719 = vrcp.f32 %v622_v12  ;;  %v629_v44 = vadd.f32 1.0, %v2718_v11  ;;  %v4130_v11 = vld [vmem:[#allocation21_spill] sm:$0xff] }
 0x14f   :  { %v614_v6 = vpop.f32.mrf.mxu1  ;;  %2721 = vrcp.f32 %v629_v44  ;;  %v4132_v44 = vld [vmem:[#allocation16_spill] sm:$0xff] }
 0x150   :  { %v615_v56 = vadd.f32 %v614_v6, %v3394_v63  ;;  %v4129_v6 = vld [vmem:[#allocation20_spill] sm:$0xff] }
 0x151   :  { %v2385_v50 = vpop.f32.mrf.mxu1 }
 0x152   :  { %v4131_v50 = vld [vmem:[#allocation24_spill] sm:$0xff] }
 0x15a   :  { %v2720_v51 = vpop.eup %2719 }
 0x15b   :  { %v632_v46 = vmul.f32 %v2720_v51, %v615_v56  ;;  %v2095_v56 = vld [vmem:[%s4044_s1 + $0x10] sm:$0xff] }
 0x15c   :  { %v2722_v5 = vpop.eup %2721  ;;  %992 = vperm.xlu1 %2714, %v2095_v56  }
 0x15d   :  { %v633_v31 = vadd.f32 %v632_v46, %v347_v57  ;;  %v635_v26 = vsub.f32 1.0, %v2722_v5  ;;  %v637_v41 = vmul.f32 0.0, %v2722_v5  ;;  %v4133_v46 = vld [vmem:[#allocation39_spill] sm:$0xff] }
 0x15f   :  { %2723 = vtanh.f32 %v633_v31  ;;  %v4126_v31 = vld [vmem:[#allocation18_spill] sm:$0xff] }
 0x16c   :  { %v2724_v45 = vpop.eup %2723 }
 0x16d   :  { %v636_v27 = vmul.f32 %v2724_v45, %v635_v26 }
 0x16f   :  { %v3397_v12 = vadd.f32 %v637_v41, %v636_v27  ;;  %v4128_v27 = vld [vmem:[#allocation23_spill] sm:$0xff]  ;;  %v4134_v41 = vld [vmem:[#allocation25_spill] sm:$0xff] }
 0x171   :  { %4122 = vst [vmem:[#allocation47_spill] sm:$0xff] %v3397_v12  ;;  %716 = vmatmul.mubr.f32.vlgmr.msra.gmra.mxu0 %v3397_v12  ;;  %2419 = vmatmul.mubr.f32.vlgmr.msra.gmra.mxu1 %v3397_v12 }
 0x172   :  { %827 = vmatpush1.msra.mxu0 %v3048_v47  ;;  %2422 = vmatpush3.msra.mxu1 %v3168_v22 }
 0x173   :  { %828 = vmatprep.subr.mxu0 %v3050_v48  ;;  %2423 = vmatprep.subr.mxu1 %v4123_v0 }
 0x174   :  { %829 = vmatpush1.msra.mxu0 %v3054_v49  ;;  %2424 = vmatpush3.msra.mxu1 %v3188_v28 }
 0x175   :  { %830 = vmatprep.subr.mxu0 %v3063_v52  ;;  %2425 = vmatprep.subr.mxu1 %v4123_v0 }
 0x176   :  { %831 = vmatpush1.msra.mxu0 %v3066_v53  ;;  %2426 = vmatpush3.msra.mxu1 %v3194_v29 }
 0x177   :  { %832 = vmatprep.subr.mxu0 %v3069_v54  ;;  %2427 = vmatprep.subr.mxu1 %v4123_v0 }
 0x178   :  { %833 = vmatpush1.msra.mxu0 %v3073_v55  ;;  %2428 = vmatpush3.msra.mxu1 %v3200_v30 }
 0x179   :  { %834 = vmatprep.subr.mxu0 %v3082_v58  ;;  %2429 = vmatprep.subr.mxu1 %v4123_v0 }
 0x17a   :  { %835 = vmatpush1.msra.mxu0 %v3085_v59  ;;  %2430 = vmatpush3.msra.mxu1 %v3208_v32 }
 0x17b   :  { %836 = vmatprep.subr.mxu0 %v3088_v60  ;;  %2431 = vmatprep.subr.mxu1 %v4123_v0 }
 0x17c   :  { %837 = vmatpush1.msra.mxu0 %v3092_v61  ;;  %2432 = vmatpush3.msra.mxu1 %v3214_v33 }
 0x17d   :  { %838 = vmatprep.subr.mxu0 %v3101_v1  ;;  %2433 = vmatprep.subr.mxu1 %v4123_v0 }
 0x17e   :  { %839 = vmatpush1.msra.mxu0 %v3104_v2  ;;  %2434 = vmatpush3.msra.mxu1 %v3219_v34 }
 0x17f   :  { %840 = vmatprep.subr.mxu0 %v3107_v3  ;;  %2435 = vmatprep.subr.mxu1 %v4123_v0 }
 0x180   :  { %841 = vmatpush1.msra.mxu0 %v3111_v4  ;;  %2436 = vmatpush3.msra.mxu1 %v3224_v35 }
 0x181   :  { %842 = vmatprep.subr.mxu0 %v3120_v7  ;;  %2437 = vmatprep.subr.mxu1 %v4123_v0 }
 0x182   :  { %843 = vmatpush1.msra.mxu0 %v3123_v8  ;;  %2438 = vmatpush3.msra.mxu1 %v3230_v36 }
 0x183   :  { %844 = vmatprep.subr.mxu0 %v3126_v9  ;;  %2439 = vmatprep.subr.mxu1 %v4123_v0 }
 0x184   :  { %845 = vmatpush1.msra.mxu0 %v3130_v10  ;;  %2440 = vmatpush3.msra.mxu1 %v3236_v37 }
 0x185   :  { %846 = vmatprep.subr.mxu0 %v3139_v13  ;;  %2441 = vmatprep.subr.mxu1 %v4123_v0 }
 0x186   :  { %847 = vmatpush1.msra.mxu0 %v3142_v14  ;;  %2442 = vmatpush3.msra.mxu1 %v3242_v38 }
 0x187   :  { %848 = vmatprep.subr.mxu0 %v3145_v15  ;;  %2443 = vmatprep.subr.mxu1 %v4123_v0 }
 0x188   :  { %849 = vmatpush1.msra.mxu0 %v3149_v16  ;;  %2444 = vmatpush3.msra.mxu1 %v3248_v39 }
 0x189   :  { %850 = vmatprep.subr.mxu0 %v3156_v18  ;;  %2445 = vmatprep.subr.mxu1 %v4123_v0 }
 0x18a   :  { %851 = vmatpush1.msra.mxu0 %v3159_v19  ;;  %2446 = vmatpush3.msra.mxu1 %v3254_v40 }
 0x18b   :  { %852 = vmatprep.subr.mxu0 %v3162_v20  ;;  %2447 = vmatprep.subr.mxu1 %v4123_v0 }
 0x18c   :  { %853 = vmatpush1.msra.mxu0 %v4124_v43  ;;  %2448 = vmatpush3.msra.mxu1 %v4125_v17 }
 0x18d   :  { %854 = vmatprep.subr.mxu0 %v4126_v31  ;;  %2449 = vmatprep.subr.mxu1 %v4123_v0 }
 0x18e   :  { %855 = vmatpush1.msra.mxu0 %v4127_v42  ;;  %2450 = vmatpush3.msra.mxu1 %v4128_v27 }
 0x18f   :  { %856 = vmatprep.subr.mxu0 %v4129_v6  ;;  %2451 = vmatprep.subr.mxu1 %v4123_v0 }
 0x190   :  { %857 = vmatpush1.msra.mxu0 %v4130_v11  ;;  %890 = vmatprep.mubr.f32.mxu0 %v4123_v0 }
 0x191   :  { %2452 = vmatpush3.msra.mxu1 %v4131_v50  ;;  %2453 = vmatprep.mubr.msk.f32.mxu1 %vm2965_vm0, %v4123_v0 }
 0x192   :  { %1001 = vmatprep.subr.mxu0 %v4132_v44  ;;  %2456 = vmatprep.subr.mxu1 %v4123_v0 }
 0x231   :  { %v717_v51 = vpop.f32.mrf.mxu0  ;;  %v788_v57 = vpop.f32.mrf.mxu1 }
 0x232   :  { %v718_v5 = vadd.f32 %v717_v51, %v4133_v46  ;;  %v789_v42 = vadd.f32 %v788_v57, %v3394_v63 }
 0x233   :  { %v719_v26 = vpop.f32.mrf.mxu0  ;;  %v2420_v45 = vpop.f32.mrf.mxu1 }
 0x234   :  { %v792_v21 = vadd.f32 %v718_v5, %v4134_v41  ;;  %v720_v25 = vadd.f32 %v719_v26, %v3379_v24  ;;  %v4136_v45 = vld [vmem:[#allocation37_spill] sm:$0xff] }
 0x236   :  { %v2090_v62 = vmul.f32 -1.442695, %v792_v21  ;;  %v799_v44 = vadd.f32 %v720_v25, %v4135_v23 }
 0x238   :  { %2725 = vpow2.f32 %v2090_v62  ;;  %v2091_v50 = vmul.f32 -1.442695, %v799_v44 }
 0x23a   :  { %2727 = vpow2.f32 %v2091_v50 }
 0x245   :  { %v2726_v11 = vpop.eup %2725 }
 0x246   :  { %v796_v6 = vadd.f32 1.0, %v2726_v11  ;;  %v4145_v11 = vld [vmem:[#allocation27_spill] sm:$0xff] }
 0x247   :  { %v2728_v56 = vpop.eup %2727 }
 0x248   :  { %2729 = vrcp.f32 %v796_v6  ;;  %v803_v27 = vadd.f32 1.0, %v2728_v56 }
 0x24a   :  { %2731 = vrcp.f32 %v803_v27 }
 0x255   :  { %v2730_v51 = vpop.eup %2729 }
 0x256   :  { %v806_v46 = vmul.f32 %v2730_v51, %v789_v42 }
 0x257   :  { %v2732_v21 = vpop.eup %2731 }
 0x258   :  { %v807_v5 = vadd.f32 %v806_v46, %v4136_v45  ;;  %v809_v26 = vsub.f32 1.0, %v2732_v21  ;;  %v811_v23 = vmul.f32 %v2732_v21, %v3397_v12  ;;  %v4146_v46 = vld [vmem:[#allocation28_spill] sm:$0xff] }
 0x25a   :  { %2733 = vtanh.f32 %v807_v5 }
 0x267   :  { %v2734_v62 = vpop.eup %2733 }
 0x268   :  { %v810_v41 = vmul.f32 %v2734_v62, %v809_v26 }
 0x26a   :  { %v3478_v25 = vadd.f32 %v811_v23, %v810_v41 }
 0x26c   :  { %4137 = vst [vmem:[#allocation17_spill] sm:$0xff] %v3478_v25  ;;  %891 = vmatmul.mubr.f32.vlgmr.msra.gmra.mxu0 %v3478_v25  ;;  %2454 = vmatmul.mubr.f32.vlgmr.msra.gmra.mxu1 %v3478_v25 }
 0x26d   :  { %1002 = vmatpush1.msra.mxu0 %v3048_v47  ;;  %2457 = vmatpush3.msra.mxu1 %v3168_v22  ;;  %v4138_v47 = vld [vmem:[#allocation19_spill] sm:$0xff] }
 0x26e   :  { %1003 = vmatprep.subr.mxu0 %v3050_v48  ;;  %2458 = vmatprep.subr.mxu1 %v4123_v0  ;;  %v4139_v48 = vld [vmem:[#allocation23_spill] sm:$0xff] }
 0x26f   :  { %1004 = vmatpush1.msra.mxu0 %v3054_v49  ;;  %2459 = vmatpush3.msra.mxu1 %v3188_v28  ;;  %v4140_v49 = vld [vmem:[#allocation20_spill] sm:$0xff] }
 0x270   :  { %1005 = vmatprep.subr.mxu0 %v3063_v52  ;;  %2460 = vmatprep.subr.mxu1 %v4123_v0  ;;  %v4141_v52 = vld [vmem:[#allocation21_spill] sm:$0xff] }
 0x271   :  { %1006 = vmatpush1.msra.mxu0 %v3066_v53  ;;  %2461 = vmatpush3.msra.mxu1 %v3194_v29  ;;  %v4142_v53 = vld [vmem:[#allocation24_spill] sm:$0xff] }
 0x272   :  { %1007 = vmatprep.subr.mxu0 %v3069_v54  ;;  %2462 = vmatprep.subr.mxu1 %v4123_v0  ;;  %v4143_v54 = vld [vmem:[#allocation16_spill] sm:$0xff] }
 0x273   :  { %1008 = vmatpush1.msra.mxu0 %v3073_v55  ;;  %2463 = vmatpush3.msra.mxu1 %v3200_v30  ;;  %v2098_v55 = vld [vmem:[%s4044_s1 + $0x18] sm:$0xff] }
 0x274   :  { %1009 = vmatprep.subr.mxu0 %v3082_v58  ;;  %2464 = vmatprep.subr.mxu1 %v4123_v0 }
 0x275   :  { %1010 = vmatpush1.msra.mxu0 %v3085_v59  ;;  %2465 = vmatpush3.msra.mxu1 %v3208_v32 }
 0x276   :  { %1011 = vmatprep.subr.mxu0 %v3088_v60  ;;  %2466 = vmatprep.subr.mxu1 %v4123_v0  ;;  %v4144_v60 = vld [vmem:[#allocation39_spill] sm:$0xff] }
 0x277   :  { %1012 = vmatpush1.msra.mxu0 %v3092_v61  ;;  %2467 = vmatpush3.msra.mxu1 %v3214_v33 }
 0x278   :  { %1013 = vmatprep.subr.mxu0 %v3101_v1  ;;  %2468 = vmatprep.subr.mxu1 %v4123_v0 }
 0x279   :  { %1014 = vmatpush1.msra.mxu0 %v3104_v2  ;;  %2469 = vmatpush3.msra.mxu1 %v3219_v34 }
 0x27a   :  { %1015 = vmatprep.subr.mxu0 %v3107_v3  ;;  %2470 = vmatprep.subr.mxu1 %v4123_v0 }
 0x27b   :  { %1016 = vmatpush1.msra.mxu0 %v3111_v4  ;;  %2471 = vmatpush3.msra.mxu1 %v3224_v35 }
 0x27c   :  { %1017 = vmatprep.subr.mxu0 %v3120_v7  ;;  %2472 = vmatprep.subr.mxu1 %v4123_v0 }
 0x27d   :  { %1018 = vmatpush1.msra.mxu0 %v3123_v8  ;;  %2473 = vmatpush3.msra.mxu1 %v3230_v36 }
 0x27e   :  { %1019 = vmatprep.subr.mxu0 %v3126_v9  ;;  %2474 = vmatprep.subr.mxu1 %v4123_v0 }
 0x27f   :  { %1020 = vmatpush1.msra.mxu0 %v3130_v10  ;;  %2475 = vmatpush3.msra.mxu1 %v3236_v37 }
 0x280   :  { %1021 = vmatprep.subr.mxu0 %v3139_v13  ;;  %2476 = vmatprep.subr.mxu1 %v4123_v0 }
 0x281   :  { %1022 = vmatpush1.msra.mxu0 %v3142_v14  ;;  %2477 = vmatpush3.msra.mxu1 %v3242_v38 }
 0x282   :  { %1023 = vmatprep.subr.mxu0 %v3145_v15  ;;  %2478 = vmatprep.subr.mxu1 %v4123_v0 }
 0x283   :  { %1024 = vmatpush1.msra.mxu0 %v3149_v16  ;;  %2479 = vmatpush3.msra.mxu1 %v3248_v39 }
 0x284   :  { %1025 = vmatprep.subr.mxu0 %v3156_v18  ;;  %2480 = vmatprep.subr.mxu1 %v4123_v0 }
 0x285   :  { %1026 = vmatpush1.msra.mxu0 %v3159_v19  ;;  %2481 = vmatpush3.msra.mxu1 %v3254_v40 }
 0x286   :  { %1027 = vmatprep.subr.mxu0 %v3162_v20  ;;  %2482 = vmatprep.subr.mxu1 %v4123_v0 }
 0x287   :  { %1028 = vmatpush1.msra.mxu0 %v4124_v43  ;;  %2483 = vmatpush3.msra.mxu1 %v4125_v17 }
 0x288   :  { %1029 = vmatprep.subr.mxu0 %v4126_v31  ;;  %2484 = vmatprep.subr.mxu1 %v4123_v0 }
 0x289   :  { %1030 = vmatpush1.msra.mxu0 %v4138_v47  ;;  %2485 = vmatpush3.msra.mxu1 %v4139_v48 }
 0x28a   :  { %1031 = vmatprep.subr.mxu0 %v4140_v49  ;;  %2486 = vmatprep.subr.mxu1 %v4123_v0 }
 0x28b   :  { %1032 = vmatpush1.msra.mxu0 %v4141_v52  ;;  %1065 = vmatprep.mubr.f32.mxu0 %v4123_v0 }
 0x28c   :  { %2487 = vmatpush3.msra.mxu1 %v4142_v53  ;;  %2488 = vmatprep.mubr.msk.f32.mxu1 %vm2965_vm0, %v4123_v0 }
 0x28d   :  { %1176 = vmatprep.subr.mxu0 %v4143_v54  ;;  %2491 = vmatprep.subr.mxu1 %v4123_v0  ;;  %v4147_v54 = vld [vmem:[#allocation42_spill] sm:$0xff] }
 0x28e   :  { %1167 = vperm.xlu1 %2714, %v2098_v55  }
 0x32c   :  { %v892_v58 = vpop.f32.mrf.mxu0  ;;  %v963_v59 = vpop.f32.mrf.mxu1 }
 0x32d   :  { %v893_v42 = vadd.f32 %v892_v58, %v4144_v60  ;;  %v964_v62 = vadd.f32 %v963_v59, %v3394_v63  ;;  %v3567_v59 = vld [vmem:[#allocation6 + $0x158] sm:$0xff] }
 0x32e   :  { %v894_v27 = vpop.f32.mrf.mxu0  ;;  %v2455_v6 = vpop.f32.mrf.mxu1 }
 0x32f   :  { %v967_v50 = vadd.f32 %v893_v42, %v4145_v11  ;;  %v895_v57 = vadd.f32 %v894_v27, %v3379_v24 }
 0x331   :  { %v2093_v44 = vmul.f32 -1.442695, %v967_v50  ;;  %v974_v56 = vadd.f32 %v895_v57, %v4146_v46  ;;  %v3571_v57 = vld [vmem:[#allocation6 + $0x150] sm:$0xff]  ;;  %v3575_v46 = vld [vmem:[#allocation6 + $0x140] sm:$0xff] }
 0x333   :  { %2735 = vpow2.f32 %v2093_v44  ;;  %v2094_v51 = vmul.f32 -1.442695, %v974_v56  ;;  %v3563_v44 = vld [vmem:[#allocation6 + $0x168] sm:$0xff]  ;;  %v3579_v56 = vld [vmem:[#allocation6 + $0x138] sm:$0xff] }
 0x335   :  { %2737 = vpow2.f32 %v2094_v51  ;;  %v3587_v51 = vld [vmem:[#allocation6 + $0x120] sm:$0xff] }
 0x340   :  { %v2736_v45 = vpop.eup %2735 }
 0x341   :  { %v971_v5 = vadd.f32 1.0, %v2736_v45  ;;  %v3595_v45 = vld [vmem:[#allocation6 + $0x108] sm:$0xff] }
 0x342   :  { %v2738_v21 = vpop.eup %2737 }
 0x343   :  { %2739 = vrcp.f32 %v971_v5  ;;  %v978_v26 = vadd.f32 1.0, %v2738_v21  ;;  %v3685_v5 = vld [vmem:[#allocation6 + $0x130] sm:$0xff]  ;;  %v3691_v21 = vld [vmem:[#allocation6 + $0x118] sm:$0xff] }
 0x345   :  { %2741 = vrcp.f32 %v978_v26  ;;  %v3696_v26 = vld [vmem:[#allocation6 + $0xf0] sm:$0xff] }
 0x350   :  { %v2740_v41 = vpop.eup %2739 }
 0x351   :  { %v981_v23 = vmul.f32 %v2740_v41, %v964_v62  ;;  %v3699_v62 = vld [vmem:[#allocation6 + $0x100] sm:$0xff] }
 0x352   :  { %v2742_v58 = vpop.eup %2741  ;;  %v3702_v41 = vld [vmem:[#allocation6 + $0xe0] sm:$0xff] }
 0x353   :  { %v982_v55 = vadd.f32 %v981_v23, %v4147_v54  ;;  %v984_v42 = vsub.f32 1.0, %v2742_v58  ;;  %v986_v11 = vmul.f32 %v2742_v58, %v3478_v25  ;;  %v3706_v23 = vld [vmem:[#allocation6 + $0xd8] sm:$0xff]  ;;  %v3709_v54 = vld [vmem:[#allocation6 + $0xe8] sm:$0xff]  ;;  %v3716_v58 = vld [vmem:[#allocation6 + $0xc0] sm:$0xff] }
 0x355   :  { %2743 = vtanh.f32 %v982_v55  ;;  %v3712_v55 = vld [vmem:[#allocation6 + $0xc8] sm:$0xff] }
 0x362   :  { %v2744_v27 = vpop.eup %2743 }
 0x363   :  { %v985_v6 = vmul.f32 %v2744_v27, %v984_v42  ;;  %v3719_v42 = vld [vmem:[#allocation6 + $0xd0] sm:$0xff] }
 0x364   :  { %v3722_v27 = vld [vmem:[#allocation6 + $0xb0] sm:$0xff] }
 0x365   :  { %v3559_v50 = vadd.f32 %v986_v11, %v985_v6  ;;  %v3726_v6 = vld [vmem:[#allocation6 + $0xa8] sm:$0xff]  ;;  %v3729_v11 = vld [vmem:[#allocation6 + $0xb8] sm:$0xff] }
 0x367   :  { %4148 = vst [vmem:[#allocation22_spill] sm:$0xff] %v3559_v50  ;;  %1066 = vmatmul.mubr.f32.vlgmr.msra.gmra.mxu0 %v3559_v50  ;;  %2489 = vmatmul.mubr.f32.vlgmr.msra.gmra.mxu1 %v3559_v50 }
 0x368   :  { %1177 = vmatpush1.msra.mxu0 %v3563_v44  ;;  %2492 = vmatpush3.msra.mxu1 %v3168_v22  ;;  %v3583_v22 = vld [vmem:[#allocation6 + $0x128] sm:$0xff] }
 0x369   :  { %1178 = vmatprep.subr.mxu0 %v3567_v59  ;;  %2493 = vmatprep.subr.mxu1 %v4123_v0 }
 0x36a   :  { %1179 = vmatpush1.msra.mxu0 %v3571_v57  ;;  %2494 = vmatpush3.msra.mxu1 %v3188_v28  ;;  %v3591_v28 = vld [vmem:[#allocation6 + $0x110] sm:$0xff] }
 0x36b   :  { %1180 = vmatprep.subr.mxu0 %v3575_v46  ;;  %2495 = vmatprep.subr.mxu1 %v4123_v0 }
 0x36c   :  { %1181 = vmatpush1.msra.mxu0 %v3579_v56  ;;  %2496 = vmatpush3.msra.mxu1 %v3194_v29  ;;  %v3599_v29 = vld [vmem:[#allocation6 + $0xf8] sm:$0xff] }
 0x36d   :  { %1182 = vmatprep.subr.mxu0 %v3583_v22  ;;  %2497 = vmatprep.subr.mxu1 %v4123_v0 }
 0x36e   :  { %1183 = vmatpush1.msra.mxu0 %v3587_v51  ;;  %2498 = vmatpush3.msra.mxu1 %v3200_v30 }
 0x36f   :  { %1184 = vmatprep.subr.mxu0 %v3591_v28  ;;  %2499 = vmatprep.subr.mxu1 %v4123_v0 }
 0x370   :  { %1185 = vmatpush1.msra.mxu0 %v3595_v45  ;;  %2500 = vmatpush3.msra.mxu1 %v3208_v32 }
 0x371   :  { %1186 = vmatprep.subr.mxu0 %v3599_v29  ;;  %2501 = vmatprep.subr.mxu1 %v4123_v0 }
 0x372   :  { %1187 = vmatpush1.msra.mxu0 %v3092_v61  ;;  %2502 = vmatpush3.msra.mxu1 %v3214_v33  ;;  %v3648_v61 = vld [vmem:[#allocation6 + $0x170] sm:$0xff] }
 0x373   :  { %1188 = vmatprep.subr.mxu0 %v3101_v1  ;;  %2503 = vmatprep.subr.mxu1 %v4123_v0  ;;  %4149 = vst [vmem:[#allocation18_spill] sm:$0xff] %v3648_v61  ;;  %v2101_v1 = vld [vmem:[%s4044_s1 + $0x20] sm:$0xff] }
 0x374   :  { %1189 = vmatpush1.msra.mxu0 %v3104_v2  ;;  %2504 = vmatpush3.msra.mxu1 %v3219_v34 }
 0x375   :  { %1190 = vmatprep.subr.mxu0 %v3107_v3  ;;  %2505 = vmatprep.subr.mxu1 %v4123_v0 }
 0x376   :  { %1191 = vmatpush1.msra.mxu0 %v3111_v4  ;;  %2506 = vmatpush3.msra.mxu1 %v3224_v35 }
 0x377   :  { %1192 = vmatprep.subr.mxu0 %v3120_v7  ;;  %2507 = vmatprep.subr.mxu1 %v4123_v0 }
 0x378   :  { %1193 = vmatpush1.msra.mxu0 %v3123_v8  ;;  %2508 = vmatpush3.msra.mxu1 %v3230_v36  ;;  %v4152_v36 = vld [vmem:[#allocation41_spill] sm:$0xff] }
 0x379   :  { %1194 = vmatprep.subr.mxu0 %v3126_v9  ;;  %2509 = vmatprep.subr.mxu1 %v4123_v0  ;;  %v4150_v9 = vld [vmem:[#allocation29_spill] sm:$0xff] }
 0x37a   :  { %1195 = vmatpush1.msra.mxu0 %v3130_v10  ;;  %2510 = vmatpush3.msra.mxu1 %v3236_v37 }
 0x37b   :  { %1196 = vmatprep.subr.mxu0 %v3139_v13  ;;  %2511 = vmatprep.subr.mxu1 %v4123_v0 }
 0x37c   :  { %1197 = vmatpush1.msra.mxu0 %v3142_v14  ;;  %2512 = vmatpush3.msra.mxu1 %v3242_v38 }
 0x37d   :  { %1198 = vmatprep.subr.mxu0 %v3145_v15  ;;  %2513 = vmatprep.subr.mxu1 %v4123_v0  ;;  %v4151_v15 = vld [vmem:[#allocation30_spill] sm:$0xff] }
 0x37e   :  { %1199 = vmatpush1.msra.mxu0 %v3149_v16  ;;  %2514 = vmatpush3.msra.mxu1 %v3248_v39 }
 0x37f   :  { %1200 = vmatprep.subr.mxu0 %v3156_v18  ;;  %2515 = vmatprep.subr.mxu1 %v4123_v0 }
 0x380   :  { %1201 = vmatpush1.msra.mxu0 %v3159_v19  ;;  %2516 = vmatpush3.msra.mxu1 %v3254_v40 }
 0x381   :  { %1202 = vmatprep.subr.mxu0 %v3162_v20  ;;  %2517 = vmatprep.subr.mxu1 %v4123_v0 }
 0x382   :  { %1203 = vmatpush1.msra.mxu0 %v4124_v43  ;;  %2518 = vmatpush3.msra.mxu1 %v4125_v17 }
 0x383   :  { %1204 = vmatprep.subr.mxu0 %v4126_v31  ;;  %2519 = vmatprep.subr.mxu1 %v4123_v0 }
 0x384   :  { %1205 = vmatpush1.msra.mxu0 %v4138_v47  ;;  %2520 = vmatpush3.msra.mxu1 %v4139_v48  ;;  %v3667_v47 = vld [vmem:[#allocation6 + $0x178] sm:$0xff] }
 0x385   :  { %1206 = vmatprep.subr.mxu0 %v4140_v49  ;;  %2521 = vmatprep.subr.mxu1 %v4123_v0  ;;  %v3673_v49 = vld [vmem:[#allocation6 + $0x160] sm:$0xff] }
 0x386   :  { %1207 = vmatpush1.msra.mxu0 %v4141_v52  ;;  %1240 = vmatprep.mubr.f32.mxu0 %v4123_v0  ;;  %v3679_v52 = vld [vmem:[#allocation6 + $0x148] sm:$0xff] }
 0x387   :  { %2522 = vmatpush3.msra.mxu1 %v4142_v53  ;;  %2523 = vmatprep.mubr.msk.f32.mxu1 %vm2965_vm0, %v4123_v0 }
 0x388   :  { %1351 = vmatprep.subr.mxu0 %v3648_v61  ;;  %2526 = vmatprep.subr.mxu1 %v4123_v0 }
 0x389   :  { %1342 = vperm.xlu0 %2713, %v2101_v1   ;;  %v3732_v1 = vld [vmem:[#allocation6 + $0x98] sm:$0xff] }
 0x427   :  { %v1067_v2 = vpop.f32.mrf.mxu0  ;;  %v1138_v3 = vpop.f32.mrf.mxu1 }
 0x428   :  { %v1068_v4 = vadd.f32 %v1067_v2, %v4144_v60  ;;  %v1139_v33 = vadd.f32 %v1138_v3, %v3394_v63  ;;  %v3736_v2 = vld [vmem:[#allocation6 + $0x90] sm:$0xff]  ;;  %v3739_v3 = vld [vmem:[#allocation6 + $0xa0] sm:$0xff] }
 0x429   :  { %v1069_v7 = vpop.f32.mrf.mxu0  ;;  %v2490_v8 = vpop.f32.mrf.mxu1 }
 0x42a   :  { %v1142_v10 = vadd.f32 %v1068_v4, %v4150_v9  ;;  %v1070_v14 = vadd.f32 %v1069_v7, %v3379_v24  ;;  %v3742_v4 = vld [vmem:[#allocation6 + $0x80] sm:$0xff]  ;;  %v3746_v7 = vld [vmem:[#allocation6 + $0x78] sm:$0xff]  ;;  %v3749_v8 = vld [vmem:[#allocation6 + $0x88] sm:$0xff] }
 0x42b   :  { %v3752_v9 = vld [vmem:[#allocation6 + $0x68] sm:$0xff] }
 0x42c   :  { %v2096_v13 = vmul.f32 -1.442695, %v1142_v10  ;;  %v1149_v16 = vadd.f32 %v1070_v14, %v4151_v15  ;;  %v3756_v10 = vld [vmem:[#allocation6 + $0x60] sm:$0xff]  ;;  %v3762_v14 = vld [vmem:[#allocation6 + $0x50] sm:$0xff]  ;;  %v3766_v15 = vld [vmem:[#allocation6 + $0x48] sm:$0xff] }
 0x42e   :  { %2745 = vpow2.f32 %v2096_v13  ;;  %v2097_v18 = vmul.f32 -1.442695, %v1149_v16  ;;  %v3759_v13 = vld [vmem:[#allocation6 + $0x70] sm:$0xff]  ;;  %v3769_v16 = vld [vmem:[#allocation6 + $0x58] sm:$0xff] }
 0x430   :  { %2747 = vpow2.f32 %v2097_v18  ;;  %v3772_v18 = vld [vmem:[#allocation6 + $0x38] sm:$0xff] }
 0x43b   :  { %v2746_v19 = vpop.eup %2745 }
 0x43c   :  { %v1146_v20 = vadd.f32 1.0, %v2746_v19  ;;  %v3776_v19 = vld [vmem:[#allocation6 + $0x30] sm:$0xff] }
 0x43d   :  { %v2748_v30 = vpop.eup %2747 }
 0x43e   :  { %2749 = vrcp.f32 %v1146_v20  ;;  %v1153_v32 = vadd.f32 1.0, %v2748_v30  ;;  %v3779_v20 = vld [vmem:[#allocation6 + $0x40] sm:$0xff] }
 0x43f   :  { %v3782_v30 = vld [vmem:[#allocation6 + $0x20] sm:$0xff] }
 0x440   :  { %2751 = vrcp.f32 %v1153_v32  ;;  %v3786_v32 = vld [vmem:[#allocation6 + $0x18] sm:$0xff] }
 0x441   :  { %4154 = vst [vmem:[#allocation26_spill] sm:$0xff] %v3786_v32 }
 0x44b   :  { %v2750_v34 = vpop.eup %2749 }
 0x44c   :  { %v1156_v35 = vmul.f32 %v2750_v34, %v1139_v33  ;;  %v3790_v33 = vld [vmem:[#allocation6 + $0x8] sm:$0xff]  ;;  %v3794_v34 = vld [vmem:[#allocation6] sm:$0xff] }
 0x44d   :  { %v2752_v38 = vpop.eup %2751  ;;  %4155 = vst [vmem:[#allocation37_spill] sm:$0xff] %v3790_v33  ;;  %4156 = vst [vmem:[#allocation19_spill] sm:$0xff] %v3794_v34 }
 0x44e   :  { %v1157_v37 = vadd.f32 %v1156_v35, %v4152_v36  ;;  %v1159_v39 = vsub.f32 1.0, %v2752_v38  ;;  %v1161_v17 = vmul.f32 %v2752_v38, %v3559_v50  ;;  %v4158_v50 = vld [vmem:[#allocation32_spill] sm:$0xff] }
 0x450   :  { %2753 = vtanh.f32 %v1157_v37 }
 0x45d   :  { %v2754_v40 = vpop.eup %2753 }
 0x45e   :  { %v1160_v43 = vmul.f32 %v2754_v40, %v1159_v39  ;;  %v4157_v40 = vld [vmem:[#allocation31_spill] sm:$0xff] }
 0x460   :  { %v3662_v31 = vadd.f32 %v1161_v17, %v1160_v43 }
 0x462   :  { %4153 = vst [vmem:[#allocation25_spill] sm:$0xff] %v3662_v31  ;;  %1241 = vmatmul.mubr.f32.vlgmr.msra.gmra.mxu0 %v3662_v31  ;;  %2524 = vmatmul.mubr.f32.vlgmr.msra.gmra.mxu1 %v3662_v31 }
 0x463   :  { %1352 = vmatpush1.msra.mxu0 %v3563_v44  ;;  %2527 = vmatpush3.msra.mxu1 %v3667_v47 }
 0x464   :  { %1353 = vmatprep.subr.mxu0 %v3567_v59  ;;  %2528 = vmatprep.subr.mxu1 %v4123_v0 }
 0x465   :  { %1354 = vmatpush1.msra.mxu0 %v3571_v57  ;;  %2529 = vmatpush3.msra.mxu1 %v3673_v49 }
 0x466   :  { %1355 = vmatprep.subr.mxu0 %v3575_v46  ;;  %2530 = vmatprep.subr.mxu1 %v4123_v0 }
 0x467   :  { %1356 = vmatpush1.msra.mxu0 %v3579_v56  ;;  %2531 = vmatpush3.msra.mxu1 %v3679_v52 }
 0x468   :  { %1357 = vmatprep.subr.mxu0 %v3583_v22  ;;  %2532 = vmatprep.subr.mxu1 %v4123_v0 }
 0x469   :  { %1358 = vmatpush1.msra.mxu0 %v3587_v51  ;;  %2533 = vmatpush3.msra.mxu1 %v3685_v5 }
 0x46a   :  { %1359 = vmatprep.subr.mxu0 %v3591_v28  ;;  %2534 = vmatprep.subr.mxu1 %v4123_v0 }
 0x46b   :  { %1360 = vmatpush1.msra.mxu0 %v3595_v45  ;;  %2535 = vmatpush3.msra.mxu1 %v3691_v21 }
 0x46c   :  { %1361 = vmatprep.subr.mxu0 %v3599_v29  ;;  %2536 = vmatprep.subr.mxu1 %v4123_v0 }
 0x46d   :  { %1362 = vmatpush1.msra.mxu0 %v3696_v26  ;;  %2537 = vmatpush3.msra.mxu1 %v3699_v62 }
 0x46e   :  { %1363 = vmatprep.subr.mxu0 %v3702_v41  ;;  %2538 = vmatprep.subr.mxu1 %v4123_v0 }
 0x46f   :  { %1364 = vmatpush1.msra.mxu0 %v3706_v23  ;;  %2539 = vmatpush3.msra.mxu1 %v3709_v54 }
 0x470   :  { %1365 = vmatprep.subr.mxu0 %v3712_v55  ;;  %2540 = vmatprep.subr.mxu1 %v4123_v0 }
 0x471   :  { %1366 = vmatpush1.msra.mxu0 %v3716_v58  ;;  %2541 = vmatpush3.msra.mxu1 %v3719_v42 }
 0x472   :  { %1367 = vmatprep.subr.mxu0 %v3722_v27  ;;  %2542 = vmatprep.subr.mxu1 %v4123_v0 }
 0x473   :  { %1368 = vmatpush1.msra.mxu0 %v3726_v6  ;;  %2543 = vmatpush3.msra.mxu1 %v3729_v11 }
 0x474   :  { %1369 = vmatprep.subr.mxu0 %v3732_v1  ;;  %2544 = vmatprep.subr.mxu1 %v4123_v0 }
 0x475   :  { %1370 = vmatpush1.msra.mxu0 %v3736_v2  ;;  %2545 = vmatpush3.msra.mxu1 %v3739_v3 }
 0x476   :  { %1371 = vmatprep.subr.mxu0 %v3742_v4  ;;  %2546 = vmatprep.subr.mxu1 %v4123_v0 }
 0x477   :  { %1372 = vmatpush1.msra.mxu0 %v3746_v7  ;;  %2547 = vmatpush3.msra.mxu1 %v3749_v8 }
 0x478   :  { %1373 = vmatprep.subr.mxu0 %v3752_v9  ;;  %2548 = vmatprep.subr.mxu1 %v4123_v0 }
 0x479   :  { %1374 = vmatpush1.msra.mxu0 %v3756_v10  ;;  %2549 = vmatpush3.msra.mxu1 %v3759_v13 }
 0x47a   :  { %1375 = vmatprep.subr.mxu0 %v3762_v14  ;;  %2550 = vmatprep.subr.mxu1 %v4123_v0 }
 0x47b   :  { %1376 = vmatpush1.msra.mxu0 %v3766_v15  ;;  %2551 = vmatpush3.msra.mxu1 %v3769_v16 }
 0x47c   :  { %1377 = vmatprep.subr.mxu0 %v3772_v18  ;;  %2552 = vmatprep.subr.mxu1 %v4123_v0 }
 0x47d   :  { %1378 = vmatpush1.msra.mxu0 %v3776_v19  ;;  %2553 = vmatpush3.msra.mxu1 %v3779_v20 }
 0x47e   :  { %1379 = vmatprep.subr.mxu0 %v3782_v30  ;;  %2554 = vmatprep.subr.mxu1 %v4123_v0 }
 0x47f   :  { %1380 = vmatpush1.msra.mxu0 %v3786_v32  ;;  %2555 = vmatpush3.msra.mxu1 %v4139_v48  ;;  %v2104_v48 = vld [vmem:[%s4044_s1 + $0x28] sm:$0xff] }
 0x480   :  { %1381 = vmatprep.subr.mxu0 %v3790_v33  ;;  %2556 = vmatprep.subr.mxu1 %v4123_v0 }
 0x481   :  { %1382 = vmatpush1.msra.mxu0 %v3794_v34  ;;  %1415 = vmatprep.mubr.f32.mxu0 %v4123_v0 }
 0x482   :  { %2557 = vmatpush3.msra.mxu1 %v4142_v53  ;;  %2558 = vmatprep.mubr.msk.f32.mxu1 %vm2965_vm0, %v4123_v0 }
 0x483   :  { %1526 = vmatprep.subr.mxu0 %v3648_v61  ;;  %2561 = vmatprep.subr.mxu1 %v4123_v0 }
 0x484   :  { %1517 = vperm.xlu1 %2714, %v2104_v48  }
 0x522   :  { %v1242_v35 = vpop.f32.mrf.mxu0  ;;  %v1313_v36 = vpop.f32.mrf.mxu1 }
 0x523   :  { %v1243_v37 = vadd.f32 %v1242_v35, %v4144_v60  ;;  %v1314_v32 = vadd.f32 %v1313_v36, %v3394_v63  ;;  %v2107_v36 = vld [vmem:[%s4044_s1 + $0x30] sm:$0xff] }
 0x524   :  { %v1244_v38 = vpop.f32.mrf.mxu0  ;;  %v2525_v39 = vpop.f32.mrf.mxu1  ;;  %1692 = vperm.xlu0 %2713, %v2107_v36  }
 0x525   :  { %v1317_v53 = vadd.f32 %v1243_v37, %v4157_v40  ;;  %v1245_v17 = vadd.f32 %v1244_v38, %v3379_v24  ;;  %v4159_v39 = vld [vmem:[#allocation44_spill] sm:$0xff] }
 0x527   :  { %v2099_v43 = vmul.f32 -1.442695, %v1317_v53  ;;  %v1324_v12 = vadd.f32 %v1245_v17, %v4158_v50  ;;  %v3874_v50 = vld [vmem:[#allocation6 + $0x28] sm:$0xff] }
 0x528   :  { %4161 = vst [vmem:[#allocation23_spill] sm:$0xff] %v3874_v50 }
 0x529   :  { %2755 = vpow2.f32 %v2099_v43  ;;  %v2100_v25 = vmul.f32 -1.442695, %v1324_v12 }
 0x52b   :  { %2757 = vpow2.f32 %v2100_v25 }
 0x536   :  { %v2756_v61 = vpop.eup %2755 }
 0x537   :  { %v1321_v34 = vadd.f32 1.0, %v2756_v61  ;;  %v4162_v61 = vld [vmem:[#allocation37_spill] sm:$0xff] }
 0x538   :  { %v2758_v48 = vpop.eup %2757 }
 0x539   :  { %2759 = vrcp.f32 %v1321_v34  ;;  %v1328_v33 = vadd.f32 1.0, %v2758_v48  ;;  %v4165_v34 = vld [vmem:[#allocation18_spill] sm:$0xff] }
 0x53b   :  { %2761 = vrcp.f32 %v1328_v33  ;;  %v3881_v33 = vld [vmem:[#allocation6 + $0x10] sm:$0xff] }
 0x53c   :  { %4164 = vst [vmem:[#allocation20_spill] sm:$0xff] %v3881_v33 }
 0x546   :  { %v2760_v35 = vpop.eup %2759 }
 0x547   :  { %v1331_v60 = vmul.f32 %v2760_v35, %v1314_v32  ;;  %v4163_v32 = vld [vmem:[#allocation19_spill] sm:$0xff] }
 0x548   :  { %v2762_v40 = vpop.eup %2761  ;;  %v4166_v35 = vld [vmem:[#allocation39_spill] sm:$0xff] }
 0x549   :  { %v1332_v37 = vadd.f32 %v1331_v60, %v4159_v39  ;;  %v1334_v38 = vsub.f32 1.0, %v2762_v40  ;;  %v1336_v12 = vmul.f32 %v2762_v40, %v3662_v31  ;;  %v4160_v60 = vld [vmem:[#allocation26_spill] sm:$0xff] }
 0x54b   :  { %2763 = vtanh.f32 %v1332_v37 }
 0x558   :  { %v2764_v53 = vpop.eup %2763 }
 0x559   :  { %v1335_v43 = vmul.f32 %v2764_v53, %v1334_v38  ;;  %v4167_v38 = vld [vmem:[#allocation33_spill] sm:$0xff] }
 0x55b   :  { %v3813_v25 = vadd.f32 %v1336_v12, %v1335_v43 }
 0x55d   :  { %1416 = vmatmul.mubr.f32.vlgmr.msra.gmra.mxu0 %v3813_v25  ;;  %2559 = vmatmul.mubr.f32.vlgmr.msra.gmra.mxu1 %v3813_v25 }
 0x55e   :  { %1527 = vmatpush1.msra.mxu0 %v3563_v44  ;;  %2562 = vmatpush3.msra.mxu1 %v3667_v47 }
 0x55f   :  { %1528 = vmatprep.subr.mxu0 %v3567_v59  ;;  %2563 = vmatprep.subr.mxu1 %v4123_v0 }
 0x560   :  { %1529 = vmatpush1.msra.mxu0 %v3571_v57  ;;  %2564 = vmatpush3.msra.mxu1 %v3673_v49 }
 0x561   :  { %1530 = vmatprep.subr.mxu0 %v3575_v46  ;;  %2565 = vmatprep.subr.mxu1 %v4123_v0 }
 0x562   :  { %1531 = vmatpush1.msra.mxu0 %v3579_v56  ;;  %2566 = vmatpush3.msra.mxu1 %v3679_v52 }
 0x563   :  { %1532 = vmatprep.subr.mxu0 %v3583_v22  ;;  %2567 = vmatprep.subr.mxu1 %v4123_v0 }
 0x564   :  { %1533 = vmatpush1.msra.mxu0 %v3587_v51  ;;  %2568 = vmatpush3.msra.mxu1 %v3685_v5 }
 0x565   :  { %1534 = vmatprep.subr.mxu0 %v3591_v28  ;;  %2569 = vmatprep.subr.mxu1 %v4123_v0 }
 0x566   :  { %1535 = vmatpush1.msra.mxu0 %v3595_v45  ;;  %2570 = vmatpush3.msra.mxu1 %v3691_v21 }
 0x567   :  { %1536 = vmatprep.subr.mxu0 %v3599_v29  ;;  %2571 = vmatprep.subr.mxu1 %v4123_v0 }
 0x568   :  { %1537 = vmatpush1.msra.mxu0 %v3696_v26  ;;  %2572 = vmatpush3.msra.mxu1 %v3699_v62 }
 0x569   :  { %1538 = vmatprep.subr.mxu0 %v3702_v41  ;;  %2573 = vmatprep.subr.mxu1 %v4123_v0 }
 0x56a   :  { %1539 = vmatpush1.msra.mxu0 %v3706_v23  ;;  %2574 = vmatpush3.msra.mxu1 %v3709_v54 }
 0x56b   :  { %1540 = vmatprep.subr.mxu0 %v3712_v55  ;;  %2575 = vmatprep.subr.mxu1 %v4123_v0 }
 0x56c   :  { %1541 = vmatpush1.msra.mxu0 %v3716_v58  ;;  %2576 = vmatpush3.msra.mxu1 %v3719_v42 }
 0x56d   :  { %1542 = vmatprep.subr.mxu0 %v3722_v27  ;;  %2577 = vmatprep.subr.mxu1 %v4123_v0 }
 0x56e   :  { %1543 = vmatpush1.msra.mxu0 %v3726_v6  ;;  %2578 = vmatpush3.msra.mxu1 %v3729_v11 }
 0x56f   :  { %1544 = vmatprep.subr.mxu0 %v3732_v1  ;;  %2579 = vmatprep.subr.mxu1 %v4123_v0 }
 0x570   :  { %1545 = vmatpush1.msra.mxu0 %v3736_v2  ;;  %2580 = vmatpush3.msra.mxu1 %v3739_v3 }
 0x571   :  { %1546 = vmatprep.subr.mxu0 %v3742_v4  ;;  %2581 = vmatprep.subr.mxu1 %v4123_v0 }
 0x572   :  { %1547 = vmatpush1.msra.mxu0 %v3746_v7  ;;  %2582 = vmatpush3.msra.mxu1 %v3749_v8 }
 0x573   :  { %1548 = vmatprep.subr.mxu0 %v3752_v9  ;;  %2583 = vmatprep.subr.mxu1 %v4123_v0 }
 0x574   :  { %1549 = vmatpush1.msra.mxu0 %v3756_v10  ;;  %2584 = vmatpush3.msra.mxu1 %v3759_v13 }
 0x575   :  { %1550 = vmatprep.subr.mxu0 %v3762_v14  ;;  %2585 = vmatprep.subr.mxu1 %v4123_v0 }
 0x576   :  { %1551 = vmatpush1.msra.mxu0 %v3766_v15  ;;  %2586 = vmatpush3.msra.mxu1 %v3769_v16 }
 0x577   :  { %1552 = vmatprep.subr.mxu0 %v3772_v18  ;;  %2587 = vmatprep.subr.mxu1 %v4123_v0 }
 0x578   :  { %1553 = vmatpush1.msra.mxu0 %v3776_v19  ;;  %2588 = vmatpush3.msra.mxu1 %v3779_v20 }
 0x579   :  { %1554 = vmatprep.subr.mxu0 %v3782_v30  ;;  %2589 = vmatprep.subr.mxu1 %v4123_v0 }
 0x57a   :  { %1555 = vmatpush1.msra.mxu0 %v4160_v60  ;;  %2590 = vmatpush3.msra.mxu1 %v3874_v50 }
 0x57b   :  { %1556 = vmatprep.subr.mxu0 %v4162_v61  ;;  %2591 = vmatprep.subr.mxu1 %v4123_v0 }
 0x57c   :  { %1557 = vmatpush1.msra.mxu0 %v4163_v32  ;;  %1590 = vmatprep.mubr.f32.mxu0 %v4123_v0 }
 0x57d   :  { %2592 = vmatpush3.msra.mxu1 %v3881_v33  ;;  %2593 = vmatprep.mubr.msk.f32.mxu1 %vm2965_vm0, %v4123_v0 }
 0x57e   :  { %1701 = vmatprep.subr.mxu0 %v4165_v34  ;;  %2596 = vmatprep.subr.mxu1 %v4123_v0  ;;  %v4168_v34 = vld [vmem:[#allocation34_spill] sm:$0xff] }
 0x61d   :  { %v1417_v17 = vpop.f32.mrf.mxu0  ;;  %v1488_v48 = vpop.f32.mrf.mxu1 }
 0x61e   :  { %v1418_v39 = vadd.f32 %v1417_v17, %v4166_v35  ;;  %v1489_v60 = vadd.f32 %v1488_v48, %v3394_v63  ;;  %v1875_v48 = vld [vmem:[#allocation8 + $0x18] sm:$0xff] }
 0x61f   :  { %v1419_v37 = vpop.f32.mrf.mxu0  ;;  %v2560_v40 = vpop.f32.mrf.mxu1 }
 0x620   :  { %v1492_v53 = vadd.f32 %v1418_v39, %v4167_v38  ;;  %v1420_v12 = vadd.f32 %v1419_v37, %v3379_v24  ;;  %v4169_v40 = vld [vmem:[#allocation43_spill] sm:$0xff] }
 0x622   :  { %v2102_v43 = vmul.f32 -1.442695, %v1492_v53  ;;  %v1499_v31 = vadd.f32 %v1420_v12, %v4168_v34  ;;  %v1873_v12 = vld [vmem:[#allocation8 + $0x8] sm:$0xff]  ;;  %v1872_v34 = vld [vmem:[#allocation8] sm:$0xff] }
 0x624   :  { %2765 = vpow2.f32 %v2102_v43  ;;  %v2103_v33 = vmul.f32 -1.442695, %v1499_v31 }
 0x626   :  { %2767 = vpow2.f32 %v2103_v33 }
 0x631   :  { %v2766_v32 = vpop.eup %2765 }
 0x632   :  { %v1496_v61 = vadd.f32 1.0, %v2766_v32  ;;  %v1876_v32 = vld [vmem:[#allocation8 + $0x20] sm:$0xff] }
 0x633   :  { %v2768_v36 = vpop.eup %2767 }
 0x634   :  { %2769 = vrcp.f32 %v1496_v61  ;;  %v1503_v50 = vadd.f32 1.0, %v2768_v36  ;;  %v1877_v61 = vld [vmem:[#allocation8 + $0x28] sm:$0xff]  ;;  %v1981_v36 = vld [vmem:[#allocation9 + $0x78] sm:$0xff] }
 0x636   :  { %2771 = vrcp.f32 %v1503_v50  ;;  %v1878_v50 = vld [vmem:[#allocation8 + $0x30] sm:$0xff] }
 0x641   :  { %v2770_v17 = vpop.eup %2769 }
 0x642   :  { %v1506_v35 = vmul.f32 %v2770_v17, %v1489_v60  ;;  %v1879_v60 = vld [vmem:[#allocation8 + $0x38] sm:$0xff]  ;;  %v1980_v17 = vld [vmem:[#allocation9 + $0x70] sm:$0xff] }
 0x643   :  { %v2772_v38 = vpop.eup %2771 }
 0x644   :  { %v1507_v39 = vadd.f32 %v1506_v35, %v4169_v40  ;;  %v1509_v37 = vsub.f32 1.0, %v2772_v38  ;;  %v1511_v31 = vmul.f32 %v2772_v38, %v3813_v25  ;;  %v1874_v35 = vld [vmem:[#allocation8 + $0x10] sm:$0xff]  ;;  %v1979_v40 = vld [vmem:[#allocation9 + $0x68] sm:$0xff]  ;;  %v1977_v38 = vld [vmem:[#allocation9 + $0x58] sm:$0xff] }
 0x646   :  { %2773 = vtanh.f32 %v1507_v39  ;;  %v1978_v39 = vld [vmem:[#allocation9 + $0x60] sm:$0xff] }
 0x653   :  { %v2774_v53 = vpop.eup %2773 }
 0x654   :  { %v1510_v43 = vmul.f32 %v2774_v53, %v1509_v37  ;;  %v1976_v37 = vld [vmem:[#allocation9 + $0x50] sm:$0xff]  ;;  %v1975_v53 = vld [vmem:[#allocation9 + $0x48] sm:$0xff] }
 0x656   :  { %v3898_v33 = vadd.f32 %v1511_v31, %v1510_v43  ;;  %v1974_v43 = vld [vmem:[#allocation9 + $0x40] sm:$0xff]  ;;  %v1973_v31 = vld [vmem:[#allocation9 + $0x38] sm:$0xff] }
 0x658   :  { %1591 = vmatmul.mubr.f32.vlgmr.msra.gmra.mxu0 %v3898_v33  ;;  %2594 = vmatmul.mubr.f32.vlgmr.msra.gmra.mxu1 %v3898_v33 }
 0x659   :  { %1702 = vmatpush1.msra.mxu0 %v3563_v44  ;;  %2597 = vmatpush3.msra.mxu1 %v3667_v47  ;;  %v4170_v44 = vld [vmem:[#allocation26_spill] sm:$0xff] }
 0x65a   :  { %1703 = vmatprep.subr.mxu0 %v3567_v59  ;;  %2598 = vmatprep.subr.mxu1 %v4123_v0  ;;  %v4171_v59 = vld [vmem:[#allocation23_spill] sm:$0xff] }
 0x65b   :  { %1704 = vmatpush1.msra.mxu0 %v3571_v57  ;;  %2599 = vmatpush3.msra.mxu1 %v3673_v49  ;;  %v4172_v57 = vld [vmem:[#allocation37_spill] sm:$0xff] }
 0x65c   :  { %1705 = vmatprep.subr.mxu0 %v3575_v46  ;;  %2600 = vmatprep.subr.mxu1 %v4123_v0  ;;  %v4173_v46 = vld [vmem:[#allocation19_spill] sm:$0xff] }
 0x65d   :  { %1706 = vmatpush1.msra.mxu0 %v3579_v56  ;;  %2601 = vmatpush3.msra.mxu1 %v3679_v52  ;;  %v4174_v56 = vld [vmem:[#allocation20_spill] sm:$0xff]  ;;  %v4176_v52 = vld [vmem:[#allocation35_spill] sm:$0xff] }
 0x65e   :  { %1707 = vmatprep.subr.mxu0 %v3583_v22  ;;  %2602 = vmatprep.subr.mxu1 %v4123_v0  ;;  %v2110_v22 = vld [vmem:[%s4044_s1 + $0x38] sm:$0xff] }
 0x65f   :  { %1708 = vmatpush1.msra.mxu0 %v3587_v51  ;;  %2603 = vmatpush3.msra.mxu1 %v3685_v5 }
 0x660   :  { %1709 = vmatprep.subr.mxu0 %v3591_v28  ;;  %2604 = vmatprep.subr.mxu1 %v4123_v0 }
 0x661   :  { %1710 = vmatpush1.msra.mxu0 %v3595_v45  ;;  %2605 = vmatpush3.msra.mxu1 %v3691_v21  ;;  %v4175_v45 = vld [vmem:[#allocation39_spill] sm:$0xff] }
 0x662   :  { %1711 = vmatprep.subr.mxu0 %v3599_v29  ;;  %2606 = vmatprep.subr.mxu1 %v4123_v0 }
 0x663   :  { %1712 = vmatpush1.msra.mxu0 %v3696_v26  ;;  %2607 = vmatpush3.msra.mxu1 %v3699_v62  ;;  %v4177_v62 = vld [vmem:[#allocation36_spill] sm:$0xff] }
 0x664   :  { %1713 = vmatprep.subr.mxu0 %v3702_v41  ;;  %2608 = vmatprep.subr.mxu1 %v4123_v0 }
 0x665   :  { %1714 = vmatpush1.msra.mxu0 %v3706_v23  ;;  %2609 = vmatpush3.msra.mxu1 %v3709_v54 }
 0x666   :  { %1715 = vmatprep.subr.mxu0 %v3712_v55  ;;  %2610 = vmatprep.subr.mxu1 %v4123_v0 }
 0x667   :  { %1716 = vmatpush1.msra.mxu0 %v3716_v58  ;;  %2611 = vmatpush3.msra.mxu1 %v3719_v42 }
 0x668   :  { %1717 = vmatprep.subr.mxu0 %v3722_v27  ;;  %2612 = vmatprep.subr.mxu1 %v4123_v0 }
 0x669   :  { %1718 = vmatpush1.msra.mxu0 %v3726_v6  ;;  %2613 = vmatpush3.msra.mxu1 %v3729_v11 }
 0x66a   :  { %1719 = vmatprep.subr.mxu0 %v3732_v1  ;;  %2614 = vmatprep.subr.mxu1 %v4123_v0  ;;  %v4178_v1 = vld [vmem:[#allocation46_spill] sm:$0xff] }
 0x66b   :  { %1720 = vmatpush1.msra.mxu0 %v3736_v2  ;;  %2615 = vmatpush3.msra.mxu1 %v3739_v3 }
 0x66c   :  { %1721 = vmatprep.subr.mxu0 %v3742_v4  ;;  %2616 = vmatprep.subr.mxu1 %v4123_v0 }
 0x66d   :  { %1722 = vmatpush1.msra.mxu0 %v3746_v7  ;;  %2617 = vmatpush3.msra.mxu1 %v3749_v8 }
 0x66e   :  { %1723 = vmatprep.subr.mxu0 %v3752_v9  ;;  %2618 = vmatprep.subr.mxu1 %v4123_v0 }
 0x66f   :  { %1724 = vmatpush1.msra.mxu0 %v3756_v10  ;;  %2619 = vmatpush3.msra.mxu1 %v3759_v13  ;;  %v1887_v13 = vld [vmem:[#allocation8 + $0x78] sm:$0xff] }
 0x670   :  { %1725 = vmatprep.subr.mxu0 %v3762_v14  ;;  %2620 = vmatprep.subr.mxu1 %v4123_v0  ;;  %v1886_v14 = vld [vmem:[#allocation8 + $0x70] sm:$0xff] }
 0x671   :  { %1726 = vmatpush1.msra.mxu0 %v3766_v15  ;;  %2621 = vmatpush3.msra.mxu1 %v3769_v16  ;;  %v1885_v15 = vld [vmem:[#allocation8 + $0x68] sm:$0xff]  ;;  %v1884_v16 = vld [vmem:[#allocation8 + $0x60] sm:$0xff] }
 0x672   :  { %1727 = vmatprep.subr.mxu0 %v3772_v18  ;;  %2622 = vmatprep.subr.mxu1 %v4123_v0  ;;  %v1883_v18 = vld [vmem:[#allocation8 + $0x58] sm:$0xff] }
 0x673   :  { %1728 = vmatpush1.msra.mxu0 %v3776_v19  ;;  %2623 = vmatpush3.msra.mxu1 %v3779_v20  ;;  %v1882_v19 = vld [vmem:[#allocation8 + $0x50] sm:$0xff]  ;;  %v1881_v20 = vld [vmem:[#allocation8 + $0x48] sm:$0xff] }
 0x674   :  { %1729 = vmatprep.subr.mxu0 %v3782_v30  ;;  %2624 = vmatprep.subr.mxu1 %v4123_v0  ;;  %v1880_v30 = vld [vmem:[#allocation8 + $0x40] sm:$0xff] }
 0x675   :  { %1730 = vmatpush1.msra.mxu0 %v4170_v44  ;;  %2625 = vmatpush3.msra.mxu1 %v4171_v59  ;;  %v1972_v44 = vld [vmem:[#allocation9 + $0x30] sm:$0xff]  ;;  %v1971_v59 = vld [vmem:[#allocation9 + $0x28] sm:$0xff] }
 0x676   :  { %1731 = vmatprep.subr.mxu0 %v4172_v57  ;;  %2626 = vmatprep.subr.mxu1 %v4123_v0  ;;  %v1970_v57 = vld [vmem:[#allocation9 + $0x20] sm:$0xff] }
 0x677   :  { %1732 = vmatpush1.msra.mxu0 %v4173_v46  ;;  %1765 = vmatprep.mubr.f32.mxu0 %v4123_v0  ;;  %v1969_v46 = vld [vmem:[#allocation9 + $0x18] sm:$0xff] }
 0x678   :  { %2627 = vmatpush3.msra.mxu1 %v4174_v56  ;;  %2628 = vmatprep.mubr.msk.f32.mxu1 %vm2965_vm0, %v4123_v0 }
 0x679   :  { %2631 = vmatprep.subr.mxu0 %v4123_v0  ;;  %2666 = vmatprep.subr.mxu1 %v4123_v0 }
 0x67a   :  { %1867 = vperm.xlu1 %2714, %v2110_v22  }
 0x718   :  { %v1592_v51 = vpop.f32.mrf.mxu0  ;;  %v1663_v28 = vpop.f32.mrf.mxu1 }
 0x719   :  { %v1593_v29 = vadd.f32 %v1592_v51, %v4175_v45  ;;  %v1664_v27 = vadd.f32 %v1663_v28, %v3394_v63 }
 0x71a   :  { %v1594_v47 = vpop.f32.mrf.mxu0  ;;  %v2595_v49 = vpop.f32.mrf.mxu1 }
 0x71b   :  { %v1667_v5 = vadd.f32 %v1593_v29, %v4176_v52  ;;  %v1595_v26 = vadd.f32 %v1594_v47, %v3379_v24  ;;  %v4179_v47 = vld [vmem:[#allocation38_spill] sm:$0xff] }
 0x71d   :  { %v2105_v21 = vmul.f32 -1.442695, %v1667_v5  ;;  %v1674_v41 = vadd.f32 %v1595_v26, %v4177_v62 }
 0x71f   :  { %2775 = vpow2.f32 %v2105_v21  ;;  %v2106_v23 = vmul.f32 -1.442695, %v1674_v41  ;;  %v4180_v21 = vld [vmem:[#allocation40_spill] sm:$0xff] }
 0x721   :  { %2777 = vpow2.f32 %v2106_v23 }
 0x72c   :  { %v2776_v54 = vpop.eup %2775 }
 0x72d   :  { %v1671_v55 = vadd.f32 1.0, %v2776_v54 }
 0x72e   :  { %v2778_v58 = vpop.eup %2777 }
 0x72f   :  { %2779 = vrcp.f32 %v1671_v55  ;;  %v1678_v42 = vadd.f32 1.0, %v2778_v58 }
 0x731   :  { %2781 = vrcp.f32 %v1678_v42 }
 0x73c   :  { %v2780_v6 = vpop.eup %2779 }
 0x73d   :  { %v1681_v11 = vmul.f32 %v2780_v6, %v1664_v27  ;;  %v643_v27 = vpop.permute.xlu0 %642  ;;  %v4181_v6 = vld [vmem:[#allocation45_spill] sm:$0xff] }
 0x73e   :  { %v2782_v3 = vpop.eup %2781 }
 0x73f   :  { %v1682_v2 = vadd.f32 %v1681_v11, %v4178_v1  ;;  %v1684_v4 = vsub.f32 1.0, %v2782_v3  ;;  %v1686_v9 = vmul.f32 %v2782_v3, %v3898_v33  ;;  %v993_v1 = vpop.permute.xlu1 %992 }
 0x741   :  { %2783 = vtanh.f32 %v1682_v2  ;;  %v4182_v2 = vld [vmem:[#allocation17_spill] sm:$0xff] }
 0x74e   :  { %v2784_v7 = vpop.eup %2783 }
 0x74f   :  { %v1685_v8 = vmul.f32 %v2784_v7, %v1684_v4  ;;  %v1168_v4 = vpop.permute.xlu1 %1167  ;;  %v4183_v7 = vld [vmem:[#allocation47_spill] sm:$0xff] }
 0x751   :  { %v3979_v10 = vadd.f32 %v1686_v9, %v1685_v8  ;;  %v645_v8 = vmul.f32 %v643_v27, %v4183_v7  ;;  %v4184_v9 = vld [vmem:[#allocation22_spill] sm:$0xff] }
 0x753   :  { %1766 = vmatmul.mubr.f32.vlgmr.msra.gmra.mxu0 %v3979_v10  ;;  %2629 = vmatmul.mubr.f32.vlgmr.msra.gmra.mxu1 %v3979_v10 }
 0x754   :  { %2663 = vmatprep.mubr.msk.f32.mxu0 %vm2965_vm0, %v4123_v0  ;;  %2698 = vmatprep.mubr.msk.f32.mxu1 %vm2965_vm0, %v4123_v0 }
 0x755   :  { %2632 = vmatpush3.msra.mxu0 %v1887_v13  ;;  %2667 = vmatpush3.msra.mxu1 %v1981_v36  ;;  %v995_v13 = vmul.f32 %v993_v1, %v4184_v9 }
 0x756   :  { %2633 = vmatprep.subr.mxu0 %v4123_v0  ;;  %2668 = vmatprep.subr.mxu1 %v4123_v0 }
 0x757   :  { %2634 = vmatpush3.msra.mxu0 %v1886_v14  ;;  %2669 = vmatpush3.msra.mxu1 %v1980_v17 }
 0x758   :  { %2635 = vmatprep.subr.mxu0 %v4123_v0  ;;  %2670 = vmatprep.subr.mxu1 %v4123_v0 }
 0x759   :  { %2636 = vmatpush3.msra.mxu0 %v1885_v15  ;;  %2671 = vmatpush3.msra.mxu1 %v1979_v40 }
 0x75a   :  { %2637 = vmatprep.subr.mxu0 %v4123_v0  ;;  %2672 = vmatprep.subr.mxu1 %v4123_v0 }
 0x75b   :  { %2638 = vmatpush3.msra.mxu0 %v1884_v16  ;;  %2673 = vmatpush3.msra.mxu1 %v1978_v39  ;;  %v4185_v16 = vld [vmem:[#allocation25_spill] sm:$0xff] }
 0x75c   :  { %2639 = vmatprep.subr.mxu0 %v4123_v0  ;;  %2674 = vmatprep.subr.mxu1 %v4123_v0 }
 0x75d   :  { %2640 = vmatpush3.msra.mxu0 %v1883_v18  ;;  %2675 = vmatpush3.msra.mxu1 %v1977_v38 }
 0x75e   :  { %2641 = vmatprep.subr.mxu0 %v4123_v0  ;;  %2676 = vmatprep.subr.mxu1 %v4123_v0 }
 0x75f   :  { %2642 = vmatpush3.msra.mxu0 %v1882_v19  ;;  %2677 = vmatpush3.msra.mxu1 %v1976_v37  ;;  %v1518_v19 = vpop.permute.xlu1 %1517 }
 0x760   :  { %2643 = vmatprep.subr.mxu0 %v4123_v0  ;;  %2678 = vmatprep.subr.mxu1 %v4123_v0 }
 0x761   :  { %2644 = vmatpush3.msra.mxu0 %v1881_v20  ;;  %2679 = vmatpush3.msra.mxu1 %v1975_v53 }
 0x762   :  { %2645 = vmatprep.subr.mxu0 %v4123_v0  ;;  %2680 = vmatprep.subr.mxu1 %v4123_v0 }
 0x763   :  { %2646 = vmatpush3.msra.mxu0 %v1880_v30  ;;  %2681 = vmatpush3.msra.mxu1 %v1974_v43  ;;  %v1868_v39 = vpop.permute.xlu1 %1867  ;;  %v1966_v43 = vld [vmem:[#allocation9] sm:$0xff] }
 0x764   :  { %2647 = vmatprep.subr.mxu0 %v4123_v0  ;;  %2682 = vmatprep.subr.mxu1 %v4123_v0 }
 0x765   :  { %2648 = vmatpush3.msra.mxu0 %v1879_v60  ;;  %2683 = vmatpush3.msra.mxu1 %v1973_v31 }
 0x766   :  { %2649 = vmatprep.subr.mxu0 %v4123_v0  ;;  %2684 = vmatprep.subr.mxu1 %v4123_v0 }
 0x767   :  { %2650 = vmatpush3.msra.mxu0 %v1878_v50  ;;  %2685 = vmatpush3.msra.mxu1 %v1972_v44 }
 0x768   :  { %2651 = vmatprep.subr.mxu0 %v4123_v0  ;;  %2686 = vmatprep.subr.mxu1 %v4123_v0 }
 0x769   :  { %2652 = vmatpush3.msra.mxu0 %v1877_v61  ;;  %2687 = vmatpush3.msra.mxu1 %v1971_v59  ;;  %v1520_v61 = vmul.f32 %v1518_v19, %v3898_v33  ;;  %v1967_v33 = vld [vmem:[#allocation9 + $0x8] sm:$0xff] }
 0x76a   :  { %2653 = vmatprep.subr.mxu0 %v4123_v0  ;;  %2688 = vmatprep.subr.mxu1 %v4123_v0 }
 0x76b   :  { %2654 = vmatpush3.msra.mxu0 %v1876_v32  ;;  %2689 = vmatpush3.msra.mxu1 %v1970_v57 }
 0x76c   :  { %2655 = vmatprep.subr.mxu0 %v4123_v0  ;;  %2690 = vmatprep.subr.mxu1 %v4123_v0 }
 0x76d   :  { %2656 = vmatpush3.msra.mxu0 %v1875_v48  ;;  %2691 = vmatpush3.msra.mxu1 %v1969_v46  ;;  %v2112_v46 = vld [vmem:[%s4053_s10] ss:$0 sm:$0xff] }
 0x76e   :  { %2657 = vmatprep.subr.mxu0 %v4123_v0  ;;  %2692 = vmatprep.subr.mxu1 %v4123_v0 }
 0x76f   :  { %2658 = vmatpush3.msra.mxu0 %v1874_v35 }
 0x770   :  { %2659 = vmatprep.subr.mxu0 %v4123_v0 }
 0x771   :  { %2660 = vmatpush3.msra.mxu0 %v1873_v12 }
 0x772   :  { %2661 = vmatprep.subr.mxu0 %v4123_v0 }
 0x773   :  { %2662 = vmatpush3.msra.mxu0 %v1872_v34 }
 0x813   :  { %v1767_v56 = vpop.f32.mrf.mxu0  ;;  %v1838_v22 = vpop.f32.mrf.mxu1 }
 0x814   :  { %v1768_v51 = vadd.f32 %v1767_v56, %v4175_v45  ;;  %v1839_v58 = vadd.f32 %v1838_v22, %v3394_v63  ;;  %v1170_v63 = vmul.f32 %v1168_v4, %v4185_v16 }
 0x815   :  { %v1769_v28 = vpop.f32.mrf.mxu0  ;;  %v2630_v29 = vpop.f32.mrf.mxu1 }
 0x816   :  { %v1842_v49 = vadd.f32 %v1768_v51, %v4179_v47  ;;  %v1770_v5 = vadd.f32 %v1769_v28, %v3379_v24  ;;  %v818_v24 = vpop.permute.xlu0 %817 }
 0x817   :  { %v820_v3 = vmul.f32 %v818_v24, %v4182_v2 }
 0x818   :  { %v2108_v52 = vmul.f32 -1.442695, %v1842_v49  ;;  %v1849_v26 = vadd.f32 %v1770_v5, %v4180_v21 }
 0x819   :  { %v821_v15 = vadd.f32 %v820_v3, %v645_v8 }
 0x81a   :  { %2785 = vpow2.f32 %v2108_v52  ;;  %v2109_v62 = vmul.f32 -1.442695, %v1849_v26  ;;  %v1343_v14 = vpop.permute.xlu0 %1342 }
 0x81b   :  { %v996_v20 = vadd.f32 %v995_v13, %v821_v15  ;;  %v1345_v30 = vmul.f32 %v1343_v14, %v3813_v25  ;;  %v1968_v25 = vld [vmem:[#allocation9 + $0x10] sm:$0xff] }
 0x81c   :  { %2787 = vpow2.f32 %v2109_v62  ;;  %2693 = vmatpush3.msra.mxu1 %v1968_v25 }
 0x81d   :  { %v1171_v50 = vadd.f32 %v1170_v63, %v996_v20  ;;  %2694 = vmatprep.subr.mxu1 %v4123_v0 }
 0x81e   :  { %v1693_v60 = vpop.permute.xlu0 %1692  ;;  %2695 = vmatpush3.msra.mxu1 %v1967_v33 }
 0x81f   :  { %v1346_v35 = vadd.f32 %v1345_v30, %v1171_v50  ;;  %v1695_v12 = vmul.f32 %v1693_v60, %v3979_v10  ;;  %2696 = vmatprep.subr.mxu1 %v4123_v0  ;;  %v2059_v0 = vld [vmem:[%s4045_s2] sm:$0xff] }
 0x820   :  { %2697 = vmatpush3.msra.mxu1 %v1966_v43 }
 0x821   :  { %v1521_v17 = vadd.f32 %v1520_v61, %v1346_v35 }
 0x823   :  { %v1696_v38 = vadd.f32 %v1695_v12, %v1521_v17 }
 0x827   :  { %v2786_v41 = vpop.eup %2785 }
 0x828   :  { %v1846_v23 = vadd.f32 1.0, %v2786_v41 }
 0x829   :  { %v2788_v54 = vpop.eup %2787 }
 0x82a   :  { %2789 = vrcp.f32 %v1846_v23  ;;  %v1853_v55 = vadd.f32 1.0, %v2788_v54 }
 0x82c   :  { %2791 = vrcp.f32 %v1853_v55 }
 0x837   :  { %v2790_v45 = vpop.eup %2789 }
 0x838   :  { %v1856_v42 = vmul.f32 %v2790_v45, %v1839_v58 }
 0x839   :  { %v2792_v18 = vpop.eup %2791 }
 0x83a   :  { %v1857_v11 = vadd.f32 %v1856_v42, %v4181_v6  ;;  %v1859_v32 = vsub.f32 1.0, %v2792_v18  ;;  %v1861_v36 = vmul.f32 %v2792_v18, %v3979_v10  ;;  %v2111_v10 = vld [vmem:[%s4051_s8] ss:$0 sm:$0xff]  ;;  %s2966_s8 = smov [#allocation11]  }
 0x83b   :  { %s2077_s13 = sshll.u32 %s2966_s8, 4  ;;  %s2078_s13 = int_to_ptr.vmem [resolvable:$true] %s2077_s13 }
 0x83c   :  { %2793 = vtanh.f32 %v1857_v11  ;;  %s2927_s10 = scalar_lea.vmem %s2078_s13, 128  ;;  %p2932_p7 = scmp.lt.s32.totalorder %s2078_s13, %s2078_s13 }
 0x83d   :  { %p2928_p6 = scmp.ne.s32.totalorder %s2078_s13, %s2927_s10  ;;  %p2933_p8 = scmp.lt.s32.totalorder %s2927_s10, %s2927_s10 }
 0x83f   :  { %p2934_p9 = por %p2933_p8, %p2932_p7 }
 0x841   :  { %p2935_p10 = pnand %p2934_p9, %p2928_p6 }
 0x849   :  { %v2794_v48 = vpop.eup %2793 }
 0x84a   :  { %v1860_v34 = vmul.f32 %v2794_v48, %v1859_v32 }
 0x84c   :  { %v1862_v40 = vadd.f32 %v1861_v36, %v1860_v34 }
 0x84e   :  { %v1870_v37 = vmul.f32 %v1868_v39, %v1862_v40 }
 0x850   :  { %v1871_v53 = vadd.f32 %v1870_v37, %v1696_v38 }
 0x852   :  { %2664 = vmatmul.mubr.f32.vlgmr.msra.gmra.mxu0 %v1871_v53 }
 0x912   :  { %v1961_v31 = vpop.f32.mrf.mxu0 }
 0x913   :  { %v1962_v44 = vadd.f32 %v2111_v10, %v1961_v31 }
 0x914   :  { %v2665_v59 = vpop.f32.mrf.mxu0 }
 0x915   :  { %v1965_v57 = vmax.f32 %v1962_v44, 0.0 }
 0x917   :  { %2699 = vmatmul.mubr.f32.vlgmr.msra.gmra.mxu1 %v1965_v57 }
 0x9d7   :  { %v2055_v56 = vpop.f32.mrf.mxu1 }
 0x9d8   :  { %v2056_v22 = vadd.f32 %v2112_v46, %v2055_v56 }
 0x9d9   :  { %v2700_v51 = vpop.f32.mrf.mxu1 }
 0x9da   :  { %v2060_v28 = vadd.f32 %v2059_v0, %v2056_v22 }
 0x9dc   :  { %2061 = vmax.xlane.f32.xlu0 %v2060_v28 }
 0xa65   :  { %v2062_v29 = vpop.xlane.xlu0 %2061 }
 0xa66   :  { %v2063_v47 = vsub.f32 %v2060_v28, %v2062_v29 }
 0xa68   :  { %v2064_v49 = vmul.f32 1.442695, %v2063_v47 }
 0xa6a   :  { %2795 = vpow2.f32 %v2064_v49 }
 0xa77   :  { %v2796_v52 = vpop.eup %2795 }
 0xa78   :  { %2066 = vadd.xlane.f32.xlu1 %v2796_v52 }
 0xb01   :  { %v2067_v5 = vpop.xlane.xlu1 %2066 }
 0xb02   :  { %2797 = vrcp.f32 %v2067_v5 }
 0xb0f   :  { %v2798_v21 = vpop.eup %2797 }
 0xb10   :  { %v2069_v26 = vmul.f32 %v2798_v21, %v2796_v52 }
 0xb12   :  { %2070 = vst [vmem:[#allocation11] sm:$0xff] %v2069_v26 }
 0xb13   :  { %2938 = shalt.err (!%p2935_p10)
}
 0xb14   :  { %2080 = dma.vmem_to_hbm [thread:$0]  %s2078_s13, 128, %s4054_s11, [#allocation5]  }
 0xb15   :  { %2953 = dma.done.wait [#allocation5], 128  }
 0xb16   :  { %2954 = vsyncadd [#allocation5], 4294967168 }
 0xb17   :  { %2084 = vsyncpa [#allocation4], 1 }
 0xb18   :  { %2085 = vsyncpa [#allocation7], 1 }
 0xb19   :  { %2086 = vsyncpa [#allocation10], 1 }
 0xb1a   :  { %2087 = vsyncpa [#allocation5], 1 }

</bundles_post_ra>
